<compile_context>
chip_gen: v5e
topology: v5e:2x2
jax: 0.10.0
libtpu: 0.0.40
codegen_flags: <defaults>
</compile_context>

<pallas_src>
import functools

import jax
import jax.numpy as jnp
from jax import lax
from jax.experimental import pallas as pl
from jax.experimental.pallas import tpu as pltpu

LN_EPS = 1e-5  # torch.nn.LayerNorm default eps


def _layernorm(v, gamma, beta):
    mu = jnp.mean(v, axis=-1, keepdims=True)
    var = jnp.mean((v - mu) ** 2, axis=-1, keepdims=True)
    return (v - mu) * lax.rsqrt(var + LN_EPS) * gamma + beta


# ----------------------------------------------------------------------------
# Fused encoder kernel: one grid step = (batch element b, layer l)
# ----------------------------------------------------------------------------
def encoder_kernel(
    tok_ref, emb_ref, cos_ref, sina_ref, sinb_ref,
    wqkv_ref, bqkv_ref, wo_ref, bo_ref,
    ln1g_ref, ln1b_ref, ln2g_ref, ln2b_ref,
    w1_ref, b1_ref, w2_ref, b2_ref,
    outg_ref, outb_ref,
    o_ref, x_vmem, *, num_heads,
):
    l = pl.program_id(1)
    nl = pl.num_programs(1)
    S, D = x_vmem.shape
    V = emb_ref.shape[0]
    H = num_heads
    hd = D // H
    scale = 1.0 / float(hd) ** 0.5

    # ---- embedding lookup (one-hot matmul gather), first layer step only ----
    @pl.when(l == 0)
    def _():
        tok = tok_ref[0]                                            # (S, 1) int32
        onehot = (lax.broadcasted_iota(jnp.int32, (S, V), 1) == tok)
        x_vmem[...] = jnp.dot(onehot.astype(jnp.float32), emb_ref[...],
                              preferred_element_type=jnp.float32)

    x = x_vmem[...]                                                 # (S, D) f32 residual stream

    # ---- attention branch:  x = x + Attn(LN1(x)) -----------------------------
    xn = _layernorm(x, ln1g_ref[0], ln1b_ref[0])
    qkv = (jnp.dot(xn.astype(jnp.bfloat16), wqkv_ref[0],
                   preferred_element_type=jnp.float32) + bqkv_ref[0])  # (S, 3D) f32

    # interleaved rotary on the fused [q | k] slab via two XLU lane-rolls:
    #   rot(t)[2i] = -t[2i+1]  (roll by W-1, weighted by sin_a)
    #   rot(t)[2i+1] =  t[2i]  (roll by  +1, weighted by sin_b)
    W = 2 * D
    qk = qkv[:, :W]
    qk = (qk * cos_ref[...]
          + pltpu.roll(qk, shift=W - 1, axis=1) * sina_ref[...]
          + pltpu.roll(qk, shift=1, axis=1) * sinb_ref[...])
    q = qk[:, :D]
    k = qk[:, D:]
    v = qkv[:, W:]

    # head-batched attention, (H, S, hd) with leading head/batch dim
    q3 = jnp.transpose(q.reshape(S, H, hd), (1, 0, 2)).astype(jnp.bfloat16)
    k3 = jnp.transpose(k.reshape(S, H, hd), (1, 0, 2)).astype(jnp.bfloat16)
    v3 = jnp.transpose(v.reshape(S, H, hd), (1, 0, 2)).astype(jnp.bfloat16)

    logits = jnp.einsum("hqd,hkd->hqk", q3, k3,
                        preferred_element_type=jnp.float32) * scale     # (H,S,S)
    m = jnp.max(logits, axis=-1, keepdims=True)                         # non-causal
    p = jnp.exp(logits - m)
    denom = jnp.sum(p, axis=-1, keepdims=True)                          # (H,S,1)
    o3 = jnp.einsum("hqk,hkd->hqd", p.astype(jnp.bfloat16), v3,
                    preferred_element_type=jnp.float32)                 # (H,S,hd)
    o3 = o3 * pl.reciprocal(denom, approx=True)    # deferred softmax normalisation (EUP)

    attn = jnp.transpose(o3, (1, 0, 2)).reshape(S, D)
    attn = (jnp.dot(attn.astype(jnp.bfloat16), wo_ref[0],
                    preferred_element_type=jnp.float32) + bo_ref[0])
    x = x + attn                                   # drop_skip_1 == identity (eval)

    # ---- feed-forward branch:  x = x + FF(LN2(x)) -----------------------------
    xn2 = _layernorm(x, ln2g_ref[0], ln2b_ref[0])
    h1 = (jnp.dot(xn2.astype(jnp.bfloat16), w1_ref[0],
                  preferred_element_type=jnp.float32) + b1_ref[0])
    # TODO(synk): FeedFowardBlock definition not provided; GELU activation assumed.
    h1 = jax.nn.gelu(h1, approximate=True)
    ff = (jnp.dot(h1.astype(jnp.bfloat16), w2_ref[0],
                  preferred_element_type=jnp.float32) + b2_ref[0])
    x = x + ff                                     # drop_skip_2 == identity (eval)

    @pl.when(l < nl - 1)
    def _():
        x_vmem[...] = x                            # keep residual stream resident in VMEM

    @pl.when(l == nl - 1)
    def _():
        o_ref[0] = _layernorm(x, outg_ref[...], outb_ref[...])   # fused output LayerNorm


# ----------------------------------------------------------------------------
# Wrapper: one pallas_call for the whole forward pass
# ----------------------------------------------------------------------------
def encoder_forward(tokens, params, rotary, num_heads):
    B, S = tokens.shape
    V, D = params["embedding"].shape
    L = params["wqkv"].shape[0]
    Hs = params["w1"].shape[2]

    cosf, sin_a, sin_b = rotary                    # precomputed once, sliced per call
    cosf, sin_a, sin_b = cosf[:S], sin_a[:S], sin_b[:S]
    tok3 = tokens.astype(jnp.int32)[:, :, None]    # (B, S, 1)

    const = lambda shape: pl.BlockSpec(shape, lambda b, l: (0,) * len(shape))
    per_layer = lambda shape: pl.BlockSpec((1,) + shape, lambda b, l: (l, 0, 0))

    kernel = functools.partial(encoder_kernel, num_heads=num_heads)
    return pl.pallas_call(
        kernel,
        out_shape=jax.ShapeDtypeStruct((B, S, D), jnp.float32),
        grid_spec=pltpu.PrefetchScalarGridSpec(
            num_scalar_prefetch=0,
            grid=(B, L),
            in_specs=[
                pl.BlockSpec((1, S, 1), lambda b, l: (b, 0, 0)),     # tokens
                const((V, D)),                                       # embedding table
                const((S, 2 * D)), const((S, 2 * D)), const((S, 2 * D)),  # cos, sin_a, sin_b
                per_layer((D, 3 * D)), per_layer((1, 3 * D)),        # wqkv, bqkv
                per_layer((D, D)), per_layer((1, D)),                # wo, bo
                per_layer((1, D)), per_layer((1, D)),                # ln1 gamma/beta
                per_layer((1, D)), per_layer((1, D)),                # ln2 gamma/beta
                per_layer((D, Hs)), per_layer((1, Hs)),              # w1, b1
                per_layer((Hs, D)), per_layer((1, D)),               # w2, b2
                const((1, D)), const((1, D)),                        # output LN gamma/beta
            ],
            out_specs=pl.BlockSpec((1, S, D), lambda b, l: (b, 0, 0)),
            scratch_shapes=[pltpu.VMEM((S, D), jnp.float32)],        # resident activation
        ),
        compiler_params=pltpu.CompilerParams(
            dimension_semantics=("parallel", "arbitrary")),
    )(
        tok3, params["embedding"], cosf, sin_a, sin_b,
        params["wqkv"], params["bqkv"], params["wo"], params["bo"],
        params["ln1_g"], params["ln1_b"], params["ln2_g"], params["ln2_b"],
        params["w1"], params["b1"], params["w2"], params["b2"],
        params["out_g"], params["out_b"],
    )


# ----------------------------------------------------------------------------
# Rotary tables & parameters (plain JAX glue, computed once)
# ----------------------------------------------------------------------------
def make_rotary(head_dim, max_seq_len, num_heads, theta=10000.0):
    """Interleaved (complex-pair) rotary tables, width 2*embed_dim so the kernel
    can rotate the fused [q | k] slab in one shot."""
    inv = 1.0 / (theta ** (jnp.arange(0, head_dim, 2, dtype=jnp.float32) / head_dim))
    t = jnp.arange(max_seq_len, dtype=jnp.float32)
    freqs = jnp.outer(t, inv)                           # (T, head_dim/2)
    cos = jnp.repeat(jnp.cos(freqs), 2, axis=-1)        # (T, head_dim) interleaved
    sin = jnp.repeat(jnp.sin(freqs), 2, axis=-1)
    reps = 2 * num_heads                                # q and k slabs side by side
    cosf = jnp.tile(cos, (1, reps))                     # (T, 2*D)
    sinf = jnp.tile(sin, (1, reps))
    even = (jnp.arange(reps * head_dim) % 2 == 0).astype(jnp.float32)[None, :]
    sin_a = -sinf * even                                # weights roll(t, W-1)  == t[j+1]
    sin_b = sinf * (1.0 - even)                         # weights roll(t, +1)   == t[j-1]
    return cosf, sin_a, sin_b


def init_params(key, vocab, num_layers, D, Hs):
    k = jax.random.split(key, 8)
    s = 0.02
    L = num_layers
    nrm = lambda kk, shape: s * jax.random.normal(kk, shape, jnp.float32)
    return dict(
        embedding=nrm(k[0], (vocab, D)),                              # kept f32 (exact lookup)
        wqkv=nrm(k[1], (L, D, 3 * D)).astype(jnp.bfloat16),
        bqkv=nrm(k[2], (L, 1, 3 * D)),
        wo=nrm(k[3], (L, D, D)).astype(jnp.bfloat16),
        bo=jnp.zeros((L, 1, D), jnp.float32),
        ln1_g=jnp.ones((L, 1, D), jnp.float32),
        ln1_b=jnp.zeros((L, 1, D), jnp.float32),
        ln2_g=jnp.ones((L, 1, D), jnp.float32),
        ln2_b=jnp.zeros((L, 1, D), jnp.float32),
        w1=nrm(k[4], (L, D, Hs)).astype(jnp.bfloat16),
        b1=nrm(k[5], (L, 1, Hs)),
        w2=nrm(k[6], (L, Hs, D)).astype(jnp.bfloat16),
        b2=jnp.zeros((L, 1, D), jnp.float32),
        out_g=jnp.ones((1, D), jnp.float32),
        out_b=jnp.zeros((1, D), jnp.float32),
    )


# ----------------------------------------------------------------------------
if __name__ == "__main__":
    # ModelArgs: vocab_size=64, num_layers=2, embed_dim=32, hidden_size=64,
    #            num_heads=4, max_seq_len >= 16 (dropout inactive in eval)
    VOCAB, NUM_LAYERS, D, HS, NH = 64, 2, 32, 64, 4
    B, S, MAX_SEQ = 2, 16, 64

    key = jax.random.PRNGKey(0)
    pkey, tkey = jax.random.split(key)
    params = init_params(pkey, VOCAB, NUM_LAYERS, D, HS)
    rotary = make_rotary(D // NH, MAX_SEQ, NH)          # hoisted: computed once
    tokens = jax.random.randint(tkey, (B, S), 0, VOCAB, dtype=jnp.int32)

    out = encoder_forward(tokens, params, rotary, NH)
    out = jax.block_until_ready(out)
    assert out.shape == (B, S, D) and out.dtype == jnp.float32
    assert bool(jnp.all(jnp.isfinite(out)))
    print("KERNEL_OK")
</pallas_src>

<mosaic_0001>
module attributes {stable_mosaic.version = 11 : i64} {
  func.func @encoder_kernel(%arg0: i32, %arg1: i32, %arg2: memref<1x16x1xi32, #tpu.memory_space<vmem>>, %arg3: memref<64x32xf32, #tpu.memory_space<vmem>>, %arg4: memref<16x64xf32, #tpu.memory_space<vmem>>, %arg5: memref<16x64xf32, #tpu.memory_space<vmem>>, %arg6: memref<16x64xf32, #tpu.memory_space<vmem>>, %arg7: memref<1x32x96xbf16, #tpu.memory_space<vmem>>, %arg8: memref<1x1x96xf32, #tpu.memory_space<vmem>>, %arg9: memref<1x32x32xbf16, #tpu.memory_space<vmem>>, %arg10: memref<1x1x32xf32, #tpu.memory_space<vmem>>, %arg11: memref<1x1x32xf32, #tpu.memory_space<vmem>>, %arg12: memref<1x1x32xf32, #tpu.memory_space<vmem>>, %arg13: memref<1x1x32xf32, #tpu.memory_space<vmem>>, %arg14: memref<1x1x32xf32, #tpu.memory_space<vmem>>, %arg15: memref<1x32x64xbf16, #tpu.memory_space<vmem>>, %arg16: memref<1x1x64xf32, #tpu.memory_space<vmem>>, %arg17: memref<1x64x32xbf16, #tpu.memory_space<vmem>>, %arg18: memref<1x1x32xf32, #tpu.memory_space<vmem>>, %arg19: memref<1x32xf32, #tpu.memory_space<vmem>>, %arg20: memref<1x32xf32, #tpu.memory_space<vmem>>, %arg21: memref<1x16x32xf32, #tpu.memory_space<vmem>>, %arg22: memref<16x32xf32, #tpu.memory_space<vmem>>) attributes {dimension_semantics = [#tpu.dimension_semantics<parallel>, #tpu.dimension_semantics<arbitrary>], iteration_bounds = array<i64: 2, 2>, scalar_prefetch = 0 : i64, scratch_operands = 1 : i64, tpu.core_type = #tpu.core_type<tc>, window_params = [{transform_indices = @transform_0, window_bounds = array<i64: 1, 16, 1>}, {pipeline_mode = #tpu.pipeline_mode<synchronous>, transform_indices = @transform_1, window_bounds = array<i64: 64, 32>}, {pipeline_mode = #tpu.pipeline_mode<synchronous>, transform_indices = @transform_2, window_bounds = array<i64: 16, 64>}, {pipeline_mode = #tpu.pipeline_mode<synchronous>, transform_indices = @transform_3, window_bounds = array<i64: 16, 64>}, {pipeline_mode = #tpu.pipeline_mode<synchronous>, transform_indices = @transform_4, window_bounds = array<i64: 16, 64>}, {transform_indices = @transform_5, window_bounds = array<i64: 1, 32, 96>}, {transform_indices = @transform_6, window_bounds = array<i64: 1, 1, 96>}, {transform_indices = @transform_7, window_bounds = array<i64: 1, 32, 32>}, {transform_indices = @transform_8, window_bounds = array<i64: 1, 1, 32>}, {transform_indices = @transform_9, window_bounds = array<i64: 1, 1, 32>}, {transform_indices = @transform_10, window_bounds = array<i64: 1, 1, 32>}, {transform_indices = @transform_11, window_bounds = array<i64: 1, 1, 32>}, {transform_indices = @transform_12, window_bounds = array<i64: 1, 1, 32>}, {transform_indices = @transform_13, window_bounds = array<i64: 1, 32, 64>}, {transform_indices = @transform_14, window_bounds = array<i64: 1, 1, 64>}, {transform_indices = @transform_15, window_bounds = array<i64: 1, 64, 32>}, {transform_indices = @transform_16, window_bounds = array<i64: 1, 1, 32>}, {pipeline_mode = #tpu.pipeline_mode<synchronous>, transform_indices = @transform_17, window_bounds = array<i64: 1, 32>}, {pipeline_mode = #tpu.pipeline_mode<synchronous>, transform_indices = @transform_18, window_bounds = array<i64: 1, 32>}, {transform_indices = @transform_19, window_bounds = array<i64: 1, 16, 32>}]} {
    %c0_i32 = arith.constant 0 : i32
    %0 = arith.cmpi eq, %arg1, %c0_i32 : i32
    %1 = arith.extui %0 : i1 to i32
    %c0_i32_0 = arith.constant 0 : i32
    %2 = arith.cmpi ne, %1, %c0_i32_0 : i32
    scf.if %2 {
      %c0_70 = arith.constant 0 : index
      %c0_71 = arith.constant 0 : index
      %c0_72 = arith.constant 0 : index
      %149 = vector.load %arg2[%c0_70, %c0_71, %c0_72] : memref<1x16x1xi32, #tpu.memory_space<vmem>>, vector<1x16x1xi32>
      %150 = vector.shape_cast %149 : vector<1x16x1xi32> to vector<16x1xi32>
      %151 = tpu.iota {dimensions = array<i32: 1>} : vector<16x64xi32>
      %152 = vector.broadcast %150 : vector<16x1xi32> to vector<16x64xi32>
      %153 = arith.cmpi eq, %151, %152 : vector<16x64xi32>
      %154 = arith.extui %153 : vector<16x64xi1> to vector<16x64xi32>
      %155 = arith.sitofp %154 : vector<16x64xi32> to vector<16x64xf32>
      %c0_73 = arith.constant 0 : index
      %c0_74 = arith.constant 0 : index
      %156 = vector.load %arg3[%c0_73, %c0_74] : memref<64x32xf32, #tpu.memory_space<vmem>>, vector<64x32xf32>
      %cst_75 = arith.constant dense<0.000000e+00> : vector<16x32xf32>
      %157 = tpu.matmul %155, %156, %cst_75 {dimension_numbers = #tpu.dot_dimension_numbers<[1], [0], [0], [1], [0, 0, 1, 1], [], []>} : vector<16x64xf32>, vector<64x32xf32>, vector<16x32xf32> -> vector<16x32xf32>
      %c0_76 = arith.constant 0 : index
      %c0_77 = arith.constant 0 : index
      %158 = vector.load %arg22[%c0_76, %c0_77] : memref<16x32xf32, #tpu.memory_space<vmem>>, vector<16x32xf32>
      tpu.vector_store %arg22[%c0_76, %c0_77], %157 {strides = array<i32>} : memref<16x32xf32, #tpu.memory_space<vmem>>, vector<16x32xf32>,
    } else {
    }
    %c0 = arith.constant 0 : index
    %c0_1 = arith.constant 0 : index
    %3 = vector.load %arg22[%c0, %c0_1] : memref<16x32xf32, #tpu.memory_space<vmem>>, vector<16x32xf32>
    %c0_2 = arith.constant 0 : index
    %c0_3 = arith.constant 0 : index
    %c0_4 = arith.constant 0 : index
    %4 = vector.load %arg11[%c0_2, %c0_3, %c0_4] : memref<1x1x32xf32, #tpu.memory_space<vmem>>, vector<1x1x32xf32>
    %5 = vector.shape_cast %4 : vector<1x1x32xf32> to vector<1x32xf32>
    %c0_5 = arith.constant 0 : index
    %c0_6 = arith.constant 0 : index
    %c0_7 = arith.constant 0 : index
    %6 = vector.load %arg12[%c0_5, %c0_6, %c0_7] : memref<1x1x32xf32, #tpu.memory_space<vmem>>, vector<1x1x32xf32>
    %7 = vector.shape_cast %6 : vector<1x1x32xf32> to vector<1x32xf32>
    %cst = arith.constant dense<0.000000e+00> : vector<16xf32>
    %8 = vector.multi_reduction <add>, %3, %cst [1] : vector<16x32xf32> to vector<16xf32>
    %9 = vector.shape_cast %8 : vector<16xf32> to vector<16x1xf32>
    %cst_8 = arith.constant 3.200000e+01 : f32
    %10 = vector.broadcast %cst_8 : f32 to vector<16x1xf32>
    %11 = arith.divf %9, %10 : vector<16x1xf32>
    %12 = vector.broadcast %11 : vector<16x1xf32> to vector<16x32xf32>
    %13 = arith.subf %3, %12 : vector<16x32xf32>
    %14 = arith.mulf %13, %13 : vector<16x32xf32>
    %cst_9 = arith.constant dense<0.000000e+00> : vector<16xf32>
    %15 = vector.multi_reduction <add>, %14, %cst_9 [1] : vector<16x32xf32> to vector<16xf32>
    %16 = vector.shape_cast %15 : vector<16xf32> to vector<16x1xf32>
    %cst_10 = arith.constant 3.200000e+01 : f32
    %17 = vector.broadcast %cst_10 : f32 to vector<16x1xf32>
    %18 = arith.divf %16, %17 : vector<16x1xf32>
    %19 = vector.broadcast %11 : vector<16x1xf32> to vector<16x32xf32>
    %20 = arith.subf %3, %19 : vector<16x32xf32>
    %cst_11 = arith.constant 9.99999974E-6 : f32
    %21 = vector.broadcast %cst_11 : f32 to vector<16x1xf32>
    %22 = arith.addf %18, %21 : vector<16x1xf32>
    %23 = math.rsqrt %22 : vector<16x1xf32>
    %24 = vector.broadcast %23 : vector<16x1xf32> to vector<16x32xf32>
    %25 = arith.mulf %20, %24 : vector<16x32xf32>
    %26 = vector.broadcast %5 : vector<1x32xf32> to vector<16x32xf32>
    %27 = arith.mulf %25, %26 : vector<16x32xf32>
    %28 = vector.broadcast %7 : vector<1x32xf32> to vector<16x32xf32>
    %29 = arith.addf %27, %28 : vector<16x32xf32>
    %30 = arith.truncf %29 : vector<16x32xf32> to vector<16x32xbf16>
    %c0_12 = arith.constant 0 : index
    %c0_13 = arith.constant 0 : index
    %c0_14 = arith.constant 0 : index
    %31 = vector.load %arg7[%c0_12, %c0_13, %c0_14] : memref<1x32x96xbf16, #tpu.memory_space<vmem>>, vector<1x32x96xbf16>
    %32 = vector.shape_cast %31 : vector<1x32x96xbf16> to vector<32x96xbf16>
    %cst_15 = arith.constant dense<0.000000e+00> : vector<16x96xf32>
    %33 = tpu.matmul %30, %32, %cst_15 {dimension_numbers = #tpu.dot_dimension_numbers<[1], [0], [0], [1], [0, 0, 1, 1], [], []>} : vector<16x32xbf16>, vector<32x96xbf16>, vector<16x96xf32> -> vector<16x96xf32>
    %c0_16 = arith.constant 0 : index
    %c0_17 = arith.constant 0 : index
    %c0_18 = arith.constant 0 : index
    %34 = vector.load %arg8[%c0_16, %c0_17, %c0_18] : memref<1x1x96xf32, #tpu.memory_space<vmem>>, vector<1x1x96xf32>
    %35 = vector.shape_cast %34 : vector<1x1x96xf32> to vector<1x96xf32>
    %36 = vector.broadcast %35 : vector<1x96xf32> to vector<16x96xf32>
    %37 = arith.addf %33, %36 : vector<16x96xf32>
    %38 = vector.extract_strided_slice %37 {offsets = [0, 0], sizes = [16, 64], strides = [1, 1]} : vector<16x96xf32> to vector<16x64xf32>
    %c0_19 = arith.constant 0 : index
    %c0_20 = arith.constant 0 : index
    %39 = vector.load %arg4[%c0_19, %c0_20] : memref<16x64xf32, #tpu.memory_space<vmem>>, vector<16x64xf32>
    %40 = arith.mulf %38, %39 : vector<16x64xf32>
    %c63_i32 = arith.constant 63 : i32
    %41 = tpu.dynamic_rotate %38 by %c63_i32 dim 1 : vector<16x64xf32>, i32 -> vector<16x64xf32>
    %c0_21 = arith.constant 0 : index
    %c0_22 = arith.constant 0 : index
    %42 = vector.load %arg5[%c0_21, %c0_22] : memref<16x64xf32, #tpu.memory_space<vmem>>, vector<16x64xf32>
    %43 = arith.mulf %41, %42 : vector<16x64xf32>
    %44 = arith.addf %40, %43 : vector<16x64xf32>
    %c1_i32 = arith.constant 1 : i32
    %45 = tpu.dynamic_rotate %38 by %c1_i32 dim 1 : vector<16x64xf32>, i32 -> vector<16x64xf32>
    %c0_23 = arith.constant 0 : index
    %c0_24 = arith.constant 0 : index
    %46 = vector.load %arg6[%c0_23, %c0_24] : memref<16x64xf32, #tpu.memory_space<vmem>>, vector<16x64xf32>
    %47 = arith.mulf %45, %46 : vector<16x64xf32>
    %48 = arith.addf %44, %47 : vector<16x64xf32>
    %49 = vector.extract_strided_slice %48 {offsets = [0, 0], sizes = [16, 32], strides = [1, 1]} : vector<16x64xf32> to vector<16x32xf32>
    %50 = vector.extract_strided_slice %48 {offsets = [0, 32], sizes = [16, 32], strides = [1, 1]} : vector<16x64xf32> to vector<16x32xf32>
    %51 = vector.extract_strided_slice %37 {offsets = [0, 64], sizes = [16, 32], strides = [1, 1]} : vector<16x96xf32> to vector<16x32xf32>
    %52 = vector.shape_cast %49 : vector<16x32xf32> to vector<16x4x8xf32>
    %53 = tpu.transpose %52, [1, 0, 2] : vector<16x4x8xf32> -> vector<4x16x8xf32>
    %54 = arith.truncf %53 : vector<4x16x8xf32> to vector<4x16x8xbf16>
    %55 = vector.shape_cast %50 : vector<16x32xf32> to vector<16x4x8xf32>
    %56 = tpu.transpose %55, [1, 0, 2] : vector<16x4x8xf32> -> vector<4x16x8xf32>
    %57 = arith.truncf %56 : vector<4x16x8xf32> to vector<4x16x8xbf16>
    %58 = vector.shape_cast %51 : vector<16x32xf32> to vector<16x4x8xf32>
    %59 = tpu.transpose %58, [1, 0, 2] : vector<16x4x8xf32> -> vector<4x16x8xf32>
    %60 = arith.truncf %59 : vector<4x16x8xf32> to vector<4x16x8xbf16>
    "tpu.trace_start"() <{level = 10 : i32, message = "hqd,hkd->hqk"}> : () -> ()
    %cst_25 = arith.constant dense<0.000000e+00> : vector<4x16x16xf32>
    %61 = tpu.matmul %54, %57, %cst_25 {dimension_numbers = #tpu.dot_dimension_numbers<[2], [2], [1], [1], [0, 0, 0, 1, 1, 1], [0], [0]>} : vector<4x16x8xbf16>, vector<4x16x8xbf16>, vector<4x16x16xf32> -> vector<4x16x16xf32>
    "tpu.trace_stop"() : () -> ()
    %cst_26 = arith.constant 0.353553385 : f32
    %62 = vector.broadcast %cst_26 : f32 to vector<4x16x16xf32>
    %63 = arith.mulf %61, %62 : vector<4x16x16xf32>
    %cst_27 = arith.constant dense<0xFF800000> : vector<4x16xf32>
    %64 = vector.multi_reduction <maximumf>, %63, %cst_27 [2] : vector<4x16x16xf32> to vector<4x16xf32>
    %65 = vector.shape_cast %64 : vector<4x16xf32> to vector<4x16x1xf32>
    %66 = vector.broadcast %65 : vector<4x16x1xf32> to vector<4x16x16xf32>
    %67 = arith.subf %63, %66 : vector<4x16x16xf32>
    %68 = math.exp %67 : vector<4x16x16xf32>
    %cst_28 = arith.constant dense<0.000000e+00> : vector<4x16xf32>
    %69 = vector.multi_reduction <add>, %68, %cst_28 [2] : vector<4x16x16xf32> to vector<4x16xf32>
    %70 = vector.shape_cast %69 : vector<4x16xf32> to vector<4x16x1xf32>
    %71 = arith.truncf %68 : vector<4x16x16xf32> to vector<4x16x16xbf16>
    "tpu.trace_start"() <{level = 10 : i32, message = "hqk,hkd->hqd"}> : () -> ()
    %cst_29 = arith.constant dense<0.000000e+00> : vector<4x16x8xf32>
    %72 = tpu.matmul %71, %60, %cst_29 {dimension_numbers = #tpu.dot_dimension_numbers<[2], [1], [1], [2], [0, 0, 0, 1, 1, 2], [0], [0]>} : vector<4x16x16xbf16>, vector<4x16x8xbf16>, vector<4x16x8xf32> -> vector<4x16x8xf32>
    "tpu.trace_stop"() : () -> ()
    %73 = tpu.reciprocal %70 {approx = true} : vector<4x16x1xf32> -> vector<4x16x1xf32>
    %74 = vector.broadcast %73 : vector<4x16x1xf32> to vector<4x16x8xf32>
    %75 = arith.mulf %72, %74 : vector<4x16x8xf32>
    %76 = tpu.transpose %75, [1, 0, 2] : vector<4x16x8xf32> -> vector<16x4x8xf32>
    %77 = vector.shape_cast %76 : vector<16x4x8xf32> to vector<16x32xf32>
    %78 = arith.truncf %77 : vector<16x32xf32> to vector<16x32xbf16>
    %c0_30 = arith.constant 0 : index
    %c0_31 = arith.constant 0 : index
    %c0_32 = arith.constant 0 : index
    %79 = vector.load %arg9[%c0_30, %c0_31, %c0_32] : memref<1x32x32xbf16, #tpu.memory_space<vmem>>, vector<1x32x32xbf16>
    %80 = vector.shape_cast %79 : vector<1x32x32xbf16> to vector<32x32xbf16>
    %cst_33 = arith.constant dense<0.000000e+00> : vector<16x32xf32>
    %81 = tpu.matmul %78, %80, %cst_33 {dimension_numbers = #tpu.dot_dimension_numbers<[1], [0], [0], [1], [0, 0, 1, 1], [], []>} : vector<16x32xbf16>, vector<32x32xbf16>, vector<16x32xf32> -> vector<16x32xf32>
    %c0_34 = arith.constant 0 : index
    %c0_35 = arith.constant 0 : index
    %c0_36 = arith.constant 0 : index
    %82 = vector.load %arg10[%c0_34, %c0_35, %c0_36] : memref<1x1x32xf32, #tpu.memory_space<vmem>>, vector<1x1x32xf32>
    %83 = vector.shape_cast %82 : vector<1x1x32xf32> to vector<1x32xf32>
    %84 = vector.broadcast %83 : vector<1x32xf32> to vector<16x32xf32>
    %85 = arith.addf %81, %84 : vector<16x32xf32>
    %86 = arith.addf %3, %85 : vector<16x32xf32>
    %c0_37 = arith.constant 0 : index
    %c0_38 = arith.constant 0 : index
    %c0_39 = arith.constant 0 : index
    %87 = vector.load %arg13[%c0_37, %c0_38, %c0_39] : memref<1x1x32xf32, #tpu.memory_space<vmem>>, vector<1x1x32xf32>
    %88 = vector.shape_cast %87 : vector<1x1x32xf32> to vector<1x32xf32>
    %c0_40 = arith.constant 0 : index
    %c0_41 = arith.constant 0 : index
    %c0_42 = arith.constant 0 : index
    %89 = vector.load %arg14[%c0_40, %c0_41, %c0_42] : memref<1x1x32xf32, #tpu.memory_space<vmem>>, vector<1x1x32xf32>
    %90 = vector.shape_cast %89 : vector<1x1x32xf32> to vector<1x32xf32>
    %cst_43 = arith.constant dense<0.000000e+00> : vector<16xf32>
    %91 = vector.multi_reduction <add>, %86, %cst_43 [1] : vector<16x32xf32> to vector<16xf32>
    %92 = vector.shape_cast %91 : vector<16xf32> to vector<16x1xf32>
    %cst_44 = arith.constant 3.200000e+01 : f32
    %93 = vector.broadcast %cst_44 : f32 to vector<16x1xf32>
    %94 = arith.divf %92, %93 : vector<16x1xf32>
    %95 = vector.broadcast %94 : vector<16x1xf32> to vector<16x32xf32>
    %96 = arith.subf %86, %95 : vector<16x32xf32>
    %97 = arith.mulf %96, %96 : vector<16x32xf32>
    %cst_45 = arith.constant dense<0.000000e+00> : vector<16xf32>
    %98 = vector.multi_reduction <add>, %97, %cst_45 [1] : vector<16x32xf32> to vector<16xf32>
    %99 = vector.shape_cast %98 : vector<16xf32> to vector<16x1xf32>
    %cst_46 = arith.constant 3.200000e+01 : f32
    %100 = vector.broadcast %cst_46 : f32 to vector<16x1xf32>
    %101 = arith.divf %99, %100 : vector<16x1xf32>
    %102 = vector.broadcast %94 : vector<16x1xf32> to vector<16x32xf32>
    %103 = arith.subf %86, %102 : vector<16x32xf32>
    %cst_47 = arith.constant 9.99999974E-6 : f32
    %104 = vector.broadcast %cst_47 : f32 to vector<16x1xf32>
    %105 = arith.addf %101, %104 : vector<16x1xf32>
    %106 = math.rsqrt %105 : vector<16x1xf32>
    %107 = vector.broadcast %106 : vector<16x1xf32> to vector<16x32xf32>
    %108 = arith.mulf %103, %107 : vector<16x32xf32>
    %109 = vector.broadcast %88 : vector<1x32xf32> to vector<16x32xf32>
    %110 = arith.mulf %108, %109 : vector<16x32xf32>
    %111 = vector.broadcast %90 : vector<1x32xf32> to vector<16x32xf32>
    %112 = arith.addf %110, %111 : vector<16x32xf32>
    %113 = arith.truncf %112 : vector<16x32xf32> to vector<16x32xbf16>
    %c0_48 = arith.constant 0 : index
    %c0_49 = arith.constant 0 : index
    %c0_50 = arith.constant 0 : index
    %114 = vector.load %arg15[%c0_48, %c0_49, %c0_50] : memref<1x32x64xbf16, #tpu.memory_space<vmem>>, vector<1x32x64xbf16>
    %115 = vector.shape_cast %114 : vector<1x32x64xbf16> to vector<32x64xbf16>
    %cst_51 = arith.constant dense<0.000000e+00> : vector<16x64xf32>
    %116 = tpu.matmul %113, %115, %cst_51 {dimension_numbers = #tpu.dot_dimension_numbers<[1], [0], [0], [1], [0, 0, 1, 1], [], []>} : vector<16x32xbf16>, vector<32x64xbf16>, vector<16x64xf32> -> vector<16x64xf32>
    %c0_52 = arith.constant 0 : index
    %c0_53 = arith.constant 0 : index
    %c0_54 = arith.constant 0 : index
    %117 = vector.load %arg16[%c0_52, %c0_53, %c0_54] : memref<1x1x64xf32, #tpu.memory_space<vmem>>, vector<1x1x64xf32>
    %118 = vector.shape_cast %117 : vector<1x1x64xf32> to vector<1x64xf32>
    %119 = vector.broadcast %118 : vector<1x64xf32> to vector<16x64xf32>
    %120 = arith.addf %116, %119 : vector<16x64xf32>
    %121 = arith.mulf %120, %120 : vector<16x64xf32>
    %122 = arith.mulf %120, %121 : vector<16x64xf32>
    %cst_55 = arith.constant 4.471500e-02 : f32
    %123 = vector.broadcast %cst_55 : f32 to vector<16x64xf32>
    %124 = arith.mulf %123, %122 : vector<16x64xf32>
    %125 = arith.addf %120, %124 : vector<16x64xf32>
    %cst_56 = arith.constant 0.797884583 : f32
    %126 = vector.broadcast %cst_56 : f32 to vector<16x64xf32>
    %127 = arith.mulf %126, %125 : vector<16x64xf32>
    %128 = math.tanh %127 : vector<16x64xf32>
    %cst_57 = arith.constant 1.000000e+00 : f32
    %129 = vector.broadcast %cst_57 : f32 to vector<16x64xf32>
    %130 = arith.addf %129, %128 : vector<16x64xf32>
    %cst_58 = arith.constant 5.000000e-01 : f32
    %131 = vector.broadcast %cst_58 : f32 to vector<16x64xf32>
    %132 = arith.mulf %131, %130 : vector<16x64xf32>
    %133 = arith.mulf %120, %132 : vector<16x64xf32>
    %134 = arith.truncf %133 : vector<16x64xf32> to vector<16x64xbf16>
    %c0_59 = arith.constant 0 : index
    %c0_60 = arith.constant 0 : index
    %c0_61 = arith.constant 0 : index
    %135 = vector.load %arg17[%c0_59, %c0_60, %c0_61] : memref<1x64x32xbf16, #tpu.memory_space<vmem>>, vector<1x64x32xbf16>
    %136 = vector.shape_cast %135 : vector<1x64x32xbf16> to vector<64x32xbf16>
    %cst_62 = arith.constant dense<0.000000e+00> : vector<16x32xf32>
    %137 = tpu.matmul %134, %136, %cst_62 {dimension_numbers = #tpu.dot_dimension_numbers<[1], [0], [0], [1], [0, 0, 1, 1], [], []>} : vector<16x64xbf16>, vector<64x32xbf16>, vector<16x32xf32> -> vector<16x32xf32>
    %c0_63 = arith.constant 0 : index
    %c0_64 = arith.constant 0 : index
    %c0_65 = arith.constant 0 : index
    %138 = vector.load %arg18[%c0_63, %c0_64, %c0_65] : memref<1x1x32xf32, #tpu.memory_space<vmem>>, vector<1x1x32xf32>
    %139 = vector.shape_cast %138 : vector<1x1x32xf32> to vector<1x32xf32>
    %140 = vector.broadcast %139 : vector<1x32xf32> to vector<16x32xf32>
    %141 = arith.addf %137, %140 : vector<16x32xf32>
    %142 = arith.addf %86, %141 : vector<16x32xf32>
    %c1_i32_66 = arith.constant 1 : i32
    %143 = arith.cmpi slt, %arg1, %c1_i32_66 : i32
    %144 = arith.extui %143 : i1 to i32
    %c0_i32_67 = arith.constant 0 : i32
    %145 = arith.cmpi ne, %144, %c0_i32_67 : i32
    scf.if %145 {
      %c0_70 = arith.constant 0 : index
      %c0_71 = arith.constant 0 : index
      %149 = vector.load %arg22[%c0_70, %c0_71] : memref<16x32xf32, #tpu.memory_space<vmem>>, vector<16x32xf32>
      tpu.vector_store %arg22[%c0_70, %c0_71], %142 {strides = array<i32>} : memref<16x32xf32, #tpu.memory_space<vmem>>, vector<16x32xf32>,
    } else {
    }
    %c1_i32_68 = arith.constant 1 : i32
    %146 = arith.cmpi eq, %arg1, %c1_i32_68 : i32
    %147 = arith.extui %146 : i1 to i32
    %c0_i32_69 = arith.constant 0 : i32
    %148 = arith.cmpi ne, %147, %c0_i32_69 : i32
    scf.if %148 {
      %c0_70 = arith.constant 0 : index
      %c0_71 = arith.constant 0 : index
      %149 = vector.load %arg19[%c0_70, %c0_71] : memref<1x32xf32, #tpu.memory_space<vmem>>, vector<1x32xf32>
      %c0_72 = arith.constant 0 : index
      %c0_73 = arith.constant 0 : index
      %150 = vector.load %arg20[%c0_72, %c0_73] : memref<1x32xf32, #tpu.memory_space<vmem>>, vector<1x32xf32>
      %cst_74 = arith.constant dense<0.000000e+00> : vector<16xf32>
      %151 = vector.multi_reduction <add>, %142, %cst_74 [1] : vector<16x32xf32> to vector<16xf32>
      %152 = vector.shape_cast %151 : vector<16xf32> to vector<16x1xf32>
      %cst_75 = arith.constant 3.200000e+01 : f32
      %153 = vector.broadcast %cst_75 : f32 to vector<16x1xf32>
      %154 = arith.divf %152, %153 : vector<16x1xf32>
      %155 = vector.broadcast %154 : vector<16x1xf32> to vector<16x32xf32>
      %156 = arith.subf %142, %155 : vector<16x32xf32>
      %157 = arith.mulf %156, %156 : vector<16x32xf32>
      %cst_76 = arith.constant dense<0.000000e+00> : vector<16xf32>
      %158 = vector.multi_reduction <add>, %157, %cst_76 [1] : vector<16x32xf32> to vector<16xf32>
      %159 = vector.shape_cast %158 : vector<16xf32> to vector<16x1xf32>
      %cst_77 = arith.constant 3.200000e+01 : f32
      %160 = vector.broadcast %cst_77 : f32 to vector<16x1xf32>
      %161 = arith.divf %159, %160 : vector<16x1xf32>
      %162 = vector.broadcast %154 : vector<16x1xf32> to vector<16x32xf32>
      %163 = arith.subf %142, %162 : vector<16x32xf32>
      %cst_78 = arith.constant 9.99999974E-6 : f32
      %164 = vector.broadcast %cst_78 : f32 to vector<16x1xf32>
      %165 = arith.addf %161, %164 : vector<16x1xf32>
      %166 = math.rsqrt %165 : vector<16x1xf32>
      %167 = vector.broadcast %166 : vector<16x1xf32> to vector<16x32xf32>
      %168 = arith.mulf %163, %167 : vector<16x32xf32>
      %169 = vector.broadcast %149 : vector<1x32xf32> to vector<16x32xf32>
      %170 = arith.mulf %168, %169 : vector<16x32xf32>
      %171 = vector.broadcast %150 : vector<1x32xf32> to vector<16x32xf32>
      %172 = arith.addf %170, %171 : vector<16x32xf32>
      %c0_79 = arith.constant 0 : index
      %c0_80 = arith.constant 0 : index
      %c0_81 = arith.constant 0 : index
      %173 = vector.load %arg21[%c0_79, %c0_80, %c0_81] : memref<1x16x32xf32, #tpu.memory_space<vmem>>, vector<1x16x32xf32>
      %174 = vector.shape_cast %173 : vector<1x16x32xf32> to vector<16x32xf32>
      %175 = vector.shape_cast %172 : vector<16x32xf32> to vector<1x16x32xf32>
      tpu.vector_store %arg21[%c0_79, %c0_80, %c0_81], %175 {strides = array<i32>} : memref<1x16x32xf32, #tpu.memory_space<vmem>>, vector<1x16x32xf32>,
    } else {
    }
    return
  }
  func.func @transform_0(%arg0: i32, %arg1: i32) -> (i32, i32, i32) {
    %c0_i32 = arith.constant 0 : i32
    %c0_i32_0 = arith.constant 0 : i32
    %c0_i32_1 = arith.constant 0 : i32
    return %arg0, %c0_i32, %c0_i32_0 : i32, i32, i32
  }
  func.func @transform_1(%arg0: i32, %arg1: i32) -> (i32, i32) {
    %c0_i32 = arith.constant 0 : i32
    %c0_i32_0 = arith.constant 0 : i32
    %c0_i32_1 = arith.constant 0 : i32
    return %c0_i32, %c0_i32_0 : i32, i32
  }
  func.func @transform_2(%arg0: i32, %arg1: i32) -> (i32, i32) {
    %c0_i32 = arith.constant 0 : i32
    %c0_i32_0 = arith.constant 0 : i32
    %c0_i32_1 = arith.constant 0 : i32
    return %c0_i32, %c0_i32_0 : i32, i32
  }
  func.func @transform_3(%arg0: i32, %arg1: i32) -> (i32, i32) {
    %c0_i32 = arith.constant 0 : i32
    %c0_i32_0 = arith.constant 0 : i32
    %c0_i32_1 = arith.constant 0 : i32
    return %c0_i32, %c0_i32_0 : i32, i32
  }
  func.func @transform_4(%arg0: i32, %arg1: i32) -> (i32, i32) {
    %c0_i32 = arith.constant 0 : i32
    %c0_i32_0 = arith.constant 0 : i32
    %c0_i32_1 = arith.constant 0 : i32
    return %c0_i32, %c0_i32_0 : i32, i32
  }
  func.func @transform_5(%arg0: i32, %arg1: i32) -> (i32, i32, i32) {
    %c0_i32 = arith.constant 0 : i32
    %c0_i32_0 = arith.constant 0 : i32
    %c0_i32_1 = arith.constant 0 : i32
    return %arg1, %c0_i32, %c0_i32_0 : i32, i32, i32
  }
  func.func @transform_6(%arg0: i32, %arg1: i32) -> (i32, i32, i32) {
    %c0_i32 = arith.constant 0 : i32
    %c0_i32_0 = arith.constant 0 : i32
    %c0_i32_1 = arith.constant 0 : i32
    return %arg1, %c0_i32, %c0_i32_0 : i32, i32, i32
  }
  func.func @transform_7(%arg0: i32, %arg1: i32) -> (i32, i32, i32) {
    %c0_i32 = arith.constant 0 : i32
    %c0_i32_0 = arith.constant 0 : i32
    %c0_i32_1 = arith.constant 0 : i32
    return %arg1, %c0_i32, %c0_i32_0 : i32, i32, i32
  }
  func.func @transform_8(%arg0: i32, %arg1: i32) -> (i32, i32, i32) {
    %c0_i32 = arith.constant 0 : i32
    %c0_i32_0 = arith.constant 0 : i32
    %c0_i32_1 = arith.constant 0 : i32
    return %arg1, %c0_i32, %c0_i32_0 : i32, i32, i32
  }
  func.func @transform_9(%arg0: i32, %arg1: i32) -> (i32, i32, i32) {
    %c0_i32 = arith.constant 0 : i32
    %c0_i32_0 = arith.constant 0 : i32
    %c0_i32_1 = arith.constant 0 : i32
    return %arg1, %c0_i32, %c0_i32_0 : i32, i32, i32
  }
  func.func @transform_10(%arg0: i32, %arg1: i32) -> (i32, i32, i32) {
    %c0_i32 = arith.constant 0 : i32
    %c0_i32_0 = arith.constant 0 : i32
    %c0_i32_1 = arith.constant 0 : i32
    return %arg1, %c0_i32, %c0_i32_0 : i32, i32, i32
  }
  func.func @transform_11(%arg0: i32, %arg1: i32) -> (i32, i32, i32) {
    %c0_i32 = arith.constant 0 : i32
    %c0_i32_0 = arith.constant 0 : i32
    %c0_i32_1 = arith.constant 0 : i32
    return %arg1, %c0_i32, %c0_i32_0 : i32, i32, i32
  }
  func.func @transform_12(%arg0: i32, %arg1: i32) -> (i32, i32, i32) {
    %c0_i32 = arith.constant 0 : i32
    %c0_i32_0 = arith.constant 0 : i32
    %c0_i32_1 = arith.constant 0 : i32
    return %arg1, %c0_i32, %c0_i32_0 : i32, i32, i32
  }
  func.func @transform_13(%arg0: i32, %arg1: i32) -> (i32, i32, i32) {
    %c0_i32 = arith.constant 0 : i32
    %c0_i32_0 = arith.constant 0 : i32
    %c0_i32_1 = arith.constant 0 : i32
    return %arg1, %c0_i32, %c0_i32_0 : i32, i32, i32
  }
  func.func @transform_14(%arg0: i32, %arg1: i32) -> (i32, i32, i32) {
    %c0_i32 = arith.constant 0 : i32
    %c0_i32_0 = arith.constant 0 : i32
    %c0_i32_1 = arith.constant 0 : i32
    return %arg1, %c0_i32, %c0_i32_0 : i32, i32, i32
  }
  func.func @transform_15(%arg0: i32, %arg1: i32) -> (i32, i32, i32) {
    %c0_i32 = arith.constant 0 : i32
    %c0_i32_0 = arith.constant 0 : i32
    %c0_i32_1 = arith.constant 0 : i32
    return %arg1, %c0_i32, %c0_i32_0 : i32, i32, i32
  }
  func.func @transform_16(%arg0: i32, %arg1: i32) -> (i32, i32, i32) {
    %c0_i32 = arith.constant 0 : i32
    %c0_i32_0 = arith.constant 0 : i32
    %c0_i32_1 = arith.constant 0 : i32
    return %arg1, %c0_i32, %c0_i32_0 : i32, i32, i32
  }
  func.func @transform_17(%arg0: i32, %arg1: i32) -> (i32, i32) {
    %c0_i32 = arith.constant 0 : i32
    %c0_i32_0 = arith.constant 0 : i32
    %c0_i32_1 = arith.constant 0 : i32
    return %c0_i32, %c0_i32_0 : i32, i32
  }
  func.func @transform_18(%arg0: i32, %arg1: i32) -> (i32, i32) {
    %c0_i32 = arith.constant 0 : i32
    %c0_i32_0 = arith.constant 0 : i32
    %c0_i32_1 = arith.constant 0 : i32
    return %c0_i32, %c0_i32_0 : i32, i32
  }
  func.func @transform_19(%arg0: i32, %arg1: i32) -> (i32, i32, i32) {
    %c0_i32 = arith.constant 0 : i32
    %c0_i32_0 = arith.constant 0 : i32
    %c0_i32_1 = arith.constant 0 : i32
    return %arg0, %c0_i32, %c0_i32_0 : i32, i32, i32
  }
}

</mosaic_0001>

<bundles_post_ra>
// kernel: tpu_custom_call.1
= control target key start
LH: loop header
LB: loop body
LE: loop exit
PB: predicated region body
PF: predicated region fallthrough
CT: control target
= control target key end

     0   :  { %s4188_s0 = inlined_call_operand.vmem [shape: s32[2,16,1], index: 0, kind: input, shape index: {}]   ;;  %s4189_s1 = inlined_call_operand.vmem [shape: f32[64,32], index: 1, kind: input, shape index: {}]   ;;  %s4190_s2 = inlined_call_operand.vmem [shape: f32[16,64], index: 2, kind: input, shape index: {}]   ;;  %s4191_s3 = inlined_call_operand.vmem [shape: f32[16,64], index: 3, kind: input, shape index: {}]   ;;  %s4192_s4 = inlined_call_operand.vmem [shape: f32[16,64], index: 4, kind: input, shape index: {}]   ;;  %s4193_s5 = inlined_call_operand.vmem [shape: bf16[2,32,96], index: 5, kind: input, shape index: {}]   ;;  %s4194_s6 = inlined_call_operand.vmem [shape: f32[2,1,96], index: 6, kind: input, shape index: {}]   ;;  %s4195_s7 = inlined_call_operand.vmem [shape: bf16[2,32,32], index: 7, kind: input, shape index: {}]   ;;  %s4196_s8 = inlined_call_operand.vmem [shape: f32[2,1,32], index: 8, kind: input, shape index: {}]   ;;  %s4197_s9 = inlined_call_operand.vmem [shape: f32[2,1,32], index: 9, kind: input, shape index: {}]   ;;  %s4198_s10 = inlined_call_operand.vmem [shape: f32[2,1,32], index: 10, kind: input, shape index: {}]   ;;  %s4199_s11 = inlined_call_operand.vmem [shape: f32[2,1,32], index: 11, kind: input, shape index: {}]   ;;  %s4200_s12 = inlined_call_operand.vmem [shape: f32[2,1,32], index: 12, kind: input, shape index: {}]   ;;  %s4201_s13 = inlined_call_operand.vmem [shape: bf16[2,32,64], index: 13, kind: input, shape index: {}]   ;;  %s4202_s14 = inlined_call_operand.vmem [shape: f32[2,1,64], index: 14, kind: input, shape index: {}]   ;;  %s4203_s15 = inlined_call_operand.vmem [shape: bf16[2,64,32], index: 15, kind: input, shape index: {}]   ;;  %s4204_s16 = inlined_call_operand.vmem [shape: f32[2,1,32], index: 16, kind: input, shape index: {}]   ;;  %s4205_s17 = inlined_call_operand.vmem [shape: f32[1,32], index: 17, kind: input, shape index: {}]   ;;  %s4206_s18 = inlined_call_operand.vmem [shape: f32[1,32], index: 18, kind: input, shape index: {}]   ;;  %s4207_s19 = inlined_call_operand.hbm [shape: f32[2,16,32], index: 19, kind: output, shape index: {}]  }
   0x1   :  { %4231 = sst [smem:[#allocation21_spill]] %s4188_s0 }
   0x2   :  { %4232 = sst [smem:[#allocation22_spill]] %s4189_s1 }
   0x3   :  { %4233 = sst [smem:[#allocation23_spill]] %s4190_s2 }
   0x4   :  { %4234 = sst [smem:[#allocation24_spill]] %s4191_s3 }
   0x5   :  { %4235 = sst [smem:[#allocation25_spill]] %s4192_s4 }
   0x6   :  { %4236 = sst [smem:[#allocation26_spill]] %s4193_s5 }
   0x7   :  { %4237 = sst [smem:[#allocation27_spill]] %s4195_s7 }
   0x8   :  { %4238 = sst [smem:[#allocation28_spill]] %s4205_s17 }
   0x9   :  { %4239 = sst [smem:[#allocation29_spill]] %s4206_s18 }
   0xa   :  { %4240 = sst [smem:[#allocation30_spill]] %s4207_s19 }
   0xb   :  { %24 = vsyncpa [#allocation4], 0 }
   0xc   :  { %26 = vsyncpa [#allocation4 + $0x1], 0  ;;  %s3429_s0 = smov 0   ;;  %s3431_s30 = smov 0  }
   0xd   :  { %s3433_s20 = smov 0   ;;  %s3435_s21 = smov 0  }
   0xe   :  { %s3437_s1 = smov 0   ;;  %s3439_s22 = smov 0  }
   0xf   :  { %s3441_s2 = smov 0   ;;  %s3443_s23 = smov 0  }
  0x10 LB: > { %4241 = sst [smem:[#allocation6_spill]] %s3281_s0  ;;  %s2874_s24 = sadd.s32 4294967295, %s3309_s23   ;;  %s3309_s23 = sphi %s3443_s23, %s32_s23   ;;  %s3305_s2 = sphi %s3441_s2, %s4293_s2   ;;  %s3301_s22 = sphi %s3439_s22, %s4292_s22   ;;  %s3297_s1 = sphi %s3437_s1, %s4291_s1   ;;  %s3293_s21 = sphi %s3435_s21, %s4290_s21   ;;  %s3289_s20 = sphi %s3433_s20, %s4289_s20   ;;  %s3285_s30 = sphi %s3431_s30, %s4288_s30   ;;  %s3281_s0 = sphi %s3429_s0, %s4287_s0  }
  0x11   : > { %4242 = sst [smem:[#allocation7_spill]] %s3285_s30  ;;  %s2875_s25 = sadd.s32 4294967294, %s3309_s23  }
  0x12   : > { %4243 = sst [smem:[#allocation8_spill]] %s3289_s20  ;;  %s41_s3 = sadd.s32 1, %s3301_s22 }
  0x13   : > { %4244 = sst [smem:[#allocation9_spill]] %s3293_s21  ;;  %p42_p0 = scmp.ge.s32.totalorder %s41_s3, 2 }
  0x14   : > { %4245 = sst [smem:[#allocation10_spill]] %s3297_s1  ;;  %s44_s26 = sadd.s32 1, %s3305_s2 }
  0x15   : > { %4246 = sst [smem:[#allocation11_spill]] %s3301_s22  ;;  %p525_p1 = scmp.ne.s32.totalorder %s3289_s20, %s3285_s30 }
  0x16   : > { %4247 = sst [smem:[#allocation12_spill]] %s3305_s2  ;;  %p526_p2 = scmp.eq.s32.totalorder %s2874_s24, 3 }
  0x17   : > { %4248 = sst [smem:[#allocation13_spill]] %s3309_s23  ;;  %s4295_s3 = smov (%p42_p0, %s41_s3), 0 }
  0x18   : > { %4249 = sst [smem:[#allocation14_spill]] %s4295_s3  ;;  %s4297_s26 = smov (!%p42_p0, %s44_s26), %s3305_s2 }
  0x19   : > { %p3478_p3 = por %p526_p2, %p525_p1  ;;  %p531_p4 = scmp.ne.s32.totalorder %s3285_s30, %s3281_s0 }
  0x1a   : > { %p46_p5 = scmp.ge.s32.totalorder %s4297_s26, 2  ;;  %p532_p6 = scmp.eq.s32.totalorder %s2875_s25, 3 }
  0x1b   : > { %s4250_s27 = scalar_select %p3478_p3, 1, 0 }
  0x1c   : > { %p2878_p7 = scmp.ge.s32.totalorder %s3309_s23, 1  ;;  %p656_p8 = scmp.lt.s32.totalorder %s3309_s23, 5 }
  0x1d   : > { %4251 = sst [smem:[#allocation15_spill]] %s4250_s27  ;;  %s4299_s26 = smov (%p46_p5, %s4297_s26), 0 }
  0x1e   : > { %4252 = sst [smem:[#allocation16_spill]] %s4299_s26  ;;  %p3488_p9 = por %p532_p6, %p531_p4 }
  0x1f   : > { %p657_p10 = pnand %p2878_p7, %p656_p8  ;;  %s512_s29 = ssub.s32 %s3305_s2, %s4299_s26 }
  0x20   : > { %s4253_s28 = scalar_select %p3488_p9, 1, 0 }
  0x21   : > { %s515_s24 = sadd.s32 1, %s3289_s20  ;;  %p513_p11 = scmp.eq.s32.totalorder %s512_s29, 0 }
  0x22   : > { %4254 = sst [smem:[#allocation17_spill]] %s4253_s28  ;;  %660 = sbr.rel (%p657_p10) target bundleno = 2941 (0xb7d), region = 96 }
  0x23   : > { %s3496_s3 = scalar_select %p513_p11, %s3289_s20, %s515_s24  }
  0x25   : > { %4255 = sst [smem:[#allocation18_spill]] %s3496_s3 }
  0x27   : > { %s4216_s25 = sand.u32 1, %s3285_s30   ;;  %p756_p12 = scmp.lt.s32.totalorder %s3297_s1, 1 }
  0x28   : > { %s2879_s22 = sshll.u32 %s4216_s25, 4  ;;  %p761_p13 = scmp.lt.s32.totalorder %s3293_s21, 1 }
  0x29   : > { %s757_s0 = scalar_select %p756_p12, %s3297_s1, 1 }
  0x2a   : > { %s3505_s28 = scalar_select %p761_p13, %s3293_s21, 1 }
  0x2b   : > { %s2954_s29 = sshll.u32 %s757_s0, 4  ;;  %s4256_s2 = sld [smem:[#allocation21_spill]] }
  0x2c   : > { %s2955_s25 = sshll.u32 %s3505_s28, 4  ;;  %s4257_s5 = sld [smem:[#allocation26_spill]] }
  0x2d   : > { %s4259_s7 = sld [smem:[#allocation27_spill]]  ;;  %s779_s24 = scalar_lea.vmem %s4197_s9, %s3505_s28 }
  0x2e   : > { %s788_s18 = scalar_lea.vmem %s4200_s12, %s3505_s28  ;;  %s3550_s21 = scalar_lea.vmem %s4201_s13, %s2955_s25 }
  0x2f   : > { %s3566_s1 = scalar_lea.vmem [#allocation3], %s2879_s22  ;;  %s4261_s17 = sld [smem:[#allocation9_spill]] }
  0x31   : > { %s3510_s3 = scalar_lea.vmem %s4256_s2, %s2954_s29  ;;  %s796_s29 = scalar_lea.vmem %s4202_s14, %s3505_s28 }
  0x32   : > { %s3516_s19 = scalar_lea.vmem %s4257_s5, %s2955_s25  ;;  %s2958_s2 = sshll.u32 %s3505_s28, 5 }
  0x33   : > { %4258 = sst [smem:[#allocation19_spill]] %s3516_s19  ;;  %s3525_s4 = scalar_lea.vmem %s4259_s7, %s2955_s25 }
  0x34   : > { %4260 = sst [smem:[#allocation20_spill]] %s3525_s4  ;;  %s804_s5 = scalar_lea.vmem %s4204_s16, %s3505_s28 }
  0x35   : > { %s3564_s27 = scalar_lea.vmem %s4203_s15, %s2958_s2  ;;  %p2890_p0 = scmp.ne.s32.totalorder %s4261_s17, 0 }
  0x36   : > { %s4262_s25 = sld [smem:[#allocation22_spill]] (!%p2890_p0) }
  0x37   : > { %809 = sbr.rel (%p2890_p0) target bundleno = 314 (0x13a), region = 100 }
  0x3c   : > { %v810_v0 = vld [vmem:[%s3510_s3] sm:$0xff]  ;;  %v833_v1 = vld [vmem:[%s4262_s25 + $0x38] sm:$0xff]  ;;  %v3311_v2 = vmov 0   ;;  %v832_v3 = vld [vmem:[%s4262_s25 + $0x30] sm:$0xff]  ;;  %v812_v11 = vlaneseq  ;;  %vm834_vm0 = vcmask 523264   ;;  %v3312_v14 = vmov 0.0  }
  0x3d   : > { %3067 = vset.pattern.permute.xlu0 %v3311_v2  ;;  %849 = vmatpush.msra.mxu0 %v833_v1  ;;  %v831_v4 = vld [vmem:[%s4262_s25 + $0x28] sm:$0xff]  ;;  %v830_v5 = vld [vmem:[%s4262_s25 + $0x20] sm:$0xff]  ;;  %v829_v6 = vld [vmem:[%s4262_s25 + $0x18] sm:$0xff]  ;;  %vm864_vm3 = vcmask 261120  }
  0x3e   : > { %815 = vperm.xlu0 %3067, %v810_v0   ;;  %2970 = vmatpush.msra.mxu1 %v833_v1  ;;  %v811_v7 = vld [vmem:[%s3510_s3 + $0x8] sm:$0xff]  ;;  %v828_v8 = vld [vmem:[%s4262_s25 + $0x10] sm:$0xff]  ;;  %v826_v10 = vld [vmem:[%s4262_s25] sm:$0xff]  ;;  %v813_v12 = vand.u32 127, %v812_v11 }
  0x3f   : > { %850 = vmatpush.msra.mxu0 %v832_v3  ;;  %v827_v9 = vld [vmem:[%s4262_s25 + $0x8] sm:$0xff] }
  0x40   : > { %2971 = vmatpush.msra.mxu1 %v832_v3 }
  0x41   : > { %851 = vmatpush.msra.mxu0 %v831_v4 }
  0x42   : > { %2972 = vmatpush.msra.mxu1 %v831_v4 }
  0x43   : > { %852 = vmatpush.msra.mxu0 %v830_v5 }
  0x44   : > { %2973 = vmatpush.msra.mxu1 %v830_v5 }
  0x45   : > { %853 = vmatpush.msra.mxu0 %v829_v6 }
  0x46   : > { %818 = vperm.xlu0 %3067, %v811_v7   ;;  %2974 = vmatpush.msra.mxu1 %v829_v6 }
  0x47   : > { %854 = vmatpush.msra.mxu0 %v828_v8 }
  0x48   : > { %2975 = vmatpush.msra.mxu1 %v828_v8 }
  0x49   : > { %855 = vmatpush.msra.mxu0 %v827_v9 }
  0x4a   : > { %2976 = vmatpush.msra.mxu1 %v827_v9 }
  0x4b   : > { %856 = vmatpush.msra.mxu0 %v826_v10 }
  0x4c   : > { %2977 = vmatpush.msra.mxu1 %v826_v10 }
  0xb0   : > { %v816_v13 = vpop.permute.xlu0 %815 }
  0xb1   : > { %vm820_vm1 = vcmp.eq.s32.totalorder %v813_v12, %v816_v13 }
  0xb2   : > { %v2891_v15 = vsel %vm820_vm1, 1.0, %v3312_v14 }
  0xb3   : > { %2893 = vmatmul.msk.f32.vlgmr.msra.gmra.mxu0 %vm834_vm0, %v2891_v15 }
  0xb8   : > { %v819_v16 = vpop.permute.xlu0 %818 }
  0xb9   : > { %vm821_vm2 = vcmp.eq.s32.totalorder %v813_v12, %v819_v16 }
  0xba   : > { %v2892_v17 = vsel %vm821_vm2, 1.0, %v3312_v14 }
  0xbb   : > { %2894 = vmatmul.msk.f32.vlgmr.msra.gmra.mxu1 %vm834_vm0, %v2892_v17 }
 0x130   : > { %v858_v18 = vpop.f32.mrf.mxu0 }
 0x131   : > { %865 = vst.msk [vmem:[#allocation2] sm:$0xff] %vm864_vm3, %v858_v18 }
 0x138   : > { %v861_v19 = vpop.f32.mrf.mxu1 }
 0x139   : > { %866 = vst.msk [vmem:[#allocation2 + $0x8] sm:$0xff] %vm864_vm3, %v861_v19 }
 0x13a PF: > { %v867_v20 = vld [vmem:[#allocation2] sm:$0xff]  ;;  %vm871_vm4 = vcmask 261120   ;;  %v3313_v24 = vmov 32.0   ;;  %s4263_s3 = sld [smem:[#allocation19_spill]]  ;;  %s4264_s30 = scalar_lea.vmem %s4198_s10, %s3505_s28  ;;  %vm975_vm12 = vcmask 1048064   ;;  %vm1053_vm13 = vcmask 1047556  }
 0x13b   : > { %v872_v21 = vsel %vm871_vm4, %v867_v20, 0.0  ;;  %3161 = vrcp.f32 %v3313_v24  ;;  %v3153_v62 = vld [vmem:[%s779_s24] ss:$0 sm:$0xff]  ;;  %s4265_s24 = scalar_lea.vmem %s4194_s6, %s3505_s28  ;;  %s3314_s7 = smov 64   ;;  %vm1809_vm14 = vcmask 64512   ;;  %vm1928_vm15 = vcmask 130048  }
 0x13c   : > { %873 = vadd.xlane.f32.xlu0 %v872_v21  ;;  %v3154_v3 = vld [vmem:[%s4264_s30] ss:$0 sm:$0xff]  ;;  %s4266_s22 = sld [smem:[#allocation24_spill]]  ;;  %s3315_s2 = smov 1   ;;  %vm2385_vm0 = vcmask 195584  }
 0x13d   : > { %v3155_v8 = vld [vmem:[%s4265_s24] ss:$0 sm:$0xff]  ;;  %s4268_s17 = sld [smem:[#allocation25_spill]]  ;;  %s3316_s4 = smov 63  }
 0x13e   : > { %s3317_s26 = smov 127   ;;  %s4269_s23 = sld [smem:[#allocation23_spill]] }
 0x13f   : > { %s3319_s24 = smov 104   ;;  %s3320_s0 = smov 112  }
 0x140   : > { %v868_v22 = vld [vmem:[#allocation2 + $0x8] sm:$0xff]  ;;  %v2959_v43 = vld [vmem:[%s4263_s3] sm:$0xff]  ;;  %s3326_s20 = smov 24  }
 0x141   : > { %v875_v23 = vsel %vm871_vm4, %v868_v22, 0.0  ;;  %v3162_v25 = vpop.eup %3161  ;;  %v2960_v41 = vld [vmem:[%s4263_s3 + $0x8] sm:$0xff] }
 0x142   : > { %v879_v26 = vmul.f32 32.0, %v3162_v25  ;;  %vm883_vm5 = vweird.f32 %v3162_v25  ;;  %963 = vmatpush.bf16.msra.mxu0 %v2960_v41  ;;  %s4267_s3 = smov %s4266_s22  ;;  %v988_v13 = vld [vmem:[%s4266_s22] sm:$0xff]  ;;  %s3318_s22 = smov 65  }
 0x143   : > { %v989_v14 = vld [vmem:[%s4267_s3 + $0x8] sm:$0xff]  ;;  %v1010_v15 = vld [vmem:[%s4268_s17] sm:$0xff] }
 0x144   : > { %876 = vadd.xlane.f32.xlu0 %v875_v23  ;;  %v880_v27 = vsub.f32 1.0, %v879_v26  ;;  %v1011_v18 = vld [vmem:[%s4268_s17 + $0x8] sm:$0xff]  ;;  %s4270_s19 = smov %s4269_s23 }
 0x146   : > { %v881_v28 = vmul.f32 %v3162_v25, %v880_v27  ;;  %964 = vmatpush.bf16.msra.mxu0 %v2959_v43 }
 0x148   : > { %v882_v29 = vadd.f32 %v3162_v25, %v881_v28 }
 0x14a   : > { %v3597_v30 = vsel %vm883_vm5, %v3162_v25, %v882_v29 }
 0x1af   : > { %v874_v31 = vpop.xlane.xlu0 %873 }
 0x1b0   : > { %v885_v32 = vmul.f32 %v3597_v30, %v874_v31 }
 0x1b2   : > { %v887_v33 = vsub.f32 %v867_v20, %v885_v32 }
 0x1b4   : > { %v889_v34 = vmul.f32 %v887_v33, %v887_v33 }
 0x1b6   : > { %v891_v35 = vsel %vm871_vm4, %v889_v34, 0.0 }
 0x1b7   : > { %892 = vadd.xlane.f32.xlu1 %v891_v35  ;;  %v877_v36 = vpop.xlane.xlu0 %876  ;;  %v971_v35 = vld [vmem:[%s4269_s23] sm:$0xff]  ;;  %s4229_s23 = smov 8  }
 0x1b8   : > { %v886_v37 = vmul.f32 %v3597_v30, %v877_v36  ;;  %v972_v36 = vld [vmem:[%s4270_s19 + $0x8] sm:$0xff] }
 0x1ba   : > { %v888_v38 = vsub.f32 %v868_v22, %v886_v37 }
 0x1bc   : > { %v890_v39 = vmul.f32 %v888_v38, %v888_v38 }
 0x1be   : > { %v894_v40 = vsel %vm871_vm4, %v890_v39, 0.0 }
 0x1bf   : > { %895 = vadd.xlane.f32.xlu1 %v894_v40 }
 0x22a   : > { %v893_v42 = vpop.xlane.xlu1 %892 }
 0x22b   : > { %v897_v44 = vmul.f32 %v893_v42, %v3597_v30 }
 0x22d   : > { %v899_v45 = vadd.f32 1e-05, %v897_v44 }
 0x22f   : > { %3163 = vrsqrt.f32 %v899_v45  ;;  %vm907_vm7 = vweird.f32 %v899_v45 }
 0x232   : > { %v896_v46 = vpop.xlane.xlu1 %895 }
 0x233   : > { %v898_v47 = vmul.f32 %v896_v46, %v3597_v30 }
 0x235   : > { %v3164_v48 = vpop.eup %3163  ;;  %v900_v49 = vadd.f32 1e-05, %v898_v47 }
 0x236   : > { %v902_v50 = vmul.f32 %v3164_v48, %v899_v45  ;;  %vm908_vm6 = vweird.f32 %v3164_v48 }
 0x237   : > { %3165 = vrsqrt.f32 %v900_v49  ;;  %vm909_vm8 = vmor %vm907_vm7, %vm908_vm6  ;;  %vm917_vm10 = vweird.f32 %v900_v49 }
 0x238   : > { %v903_v51 = vmul.f32 %v3164_v48, %v902_v50 }
 0x23a   : > { %v904_v52 = vmul.f32 0.5, %v903_v51  ;;  %v3323_v51 = vmov 1983009808  }
 0x23c   : > { %v905_v53 = vsub.f32 1.5, %v904_v52  ;;  %v1058_v52 = vunpack.c.l.s4 %v3323_v51 }
 0x23d   : > { %v3166_v54 = vpop.eup %3165 }
 0x23e   : > { %v906_v55 = vmul.f32 %v3164_v48, %v905_v53  ;;  %v912_v56 = vmul.f32 %v3166_v54, %v900_v49  ;;  %vm918_vm9 = vweird.f32 %v3166_v54  ;;  %v3324_v53 = vmov 1934713408  }
 0x23f   : > { %vm919_vm11 = vmor %vm917_vm10, %vm918_vm9 }
 0x240   : > { %v913_v57 = vmul.f32 %v3166_v54, %v912_v56  ;;  %v910_v58 = vsel %vm909_vm8, %v3164_v48, %v906_v55  ;;  %v3663_v55 = vunpack.c.0.s8 %v1058_v52  ;;  %vm2577_vm8 = vcmask 523264  }
 0x241   : > { %v921_v61 = vmul.f32 %v910_v58, %v887_v33 }
 0x242   : > { %v914_v59 = vmul.f32 0.5, %v913_v57 }
 0x243   : > { %v926_v2 = vmul.f32 %v3153_v62, %v921_v61 }
 0x244   : > { %v915_v60 = vsub.f32 1.5, %v914_v59 }
 0x245   : > { %v931_v5 = vadd.f32 %v3154_v3, %v926_v2 }
 0x246   : > { %v916_v63 = vmul.f32 %v3166_v54, %v915_v60 }
 0x248   : > { %v920_v0 = vsel %vm919_vm11, %v3166_v54, %v916_v63  ;;  %v1082_v54 = vunpack.c.l.s4 %v3324_v53 }
 0x249   : > { %v922_v1 = vmul.f32 %v920_v0, %v888_v38 }
 0x24a   : > { %v3665_v61 = vunpack.c.0.s8 %v1082_v54 }
 0x24b   : > { %v927_v4 = vmul.f32 %v3153_v62, %v922_v1 }
 0x24d   : > { %v932_v6 = vadd.f32 %v3154_v3, %v927_v4 }
 0x24f   : > { %v933_v7 = vpack.c.bf16 %v932_v6, %v931_v5 }
 0x251   : > { %2903 = vmatmul.msk.bf16.vlgmr.msra.gmra.mxu0 %vm871_vm4, %v933_v7 }
 0x2ce   : > { %v966_v9 = vpop.f32.mrf.mxu0 }
 0x2cf   : > { %v3623_v10 = vadd.f32 %v3155_v8, %v966_v9 }
 0x2d1   : > { %976 = vrot.lane.b32.xlu2 %v3623_v10, %s3314_s7  ;;  %v973_v37 = vmul.f32 %v971_v35, %v3623_v10 }
 0x2d6   : > { %v968_v11 = vpop.f32.mrf.mxu0 }
 0x2d7   : > { %v969_v12 = vadd.f32 %v3155_v8, %v968_v11 }
 0x2d9   : > { %979 = vrot.lane.b32.xlu2 %v969_v12, %s3314_s7  ;;  %v974_v38 = vmul.f32 %v972_v36, %v969_v12  ;;  %v3660_v50 = vpack.i.bf16 %v969_v12, %v3623_v10 }
 0x2e1   : > { %992 = vrot.lane.b32.xlu2 %v988_v13, %s3315_s2 }
 0x2e9   : > { %994 = vrot.lane.b32.xlu2 %v989_v14, %s3315_s2  ;;  %s3325_s2 = smov 16  }
 0x2f1   : > { %1014 = vrot.lane.b32.xlu2 %v1010_v15, %s3316_s4 }
 0x32b   : > { %v977_v16 = vpop.permute.xlu2 %976 }
 0x32c   : > { %v978_v17 = vsel %vm975_vm12, %v977_v16, %v3623_v10 }
 0x32d   : > { %982 = vrot.lane.b32.xlu0 %v978_v17, %s3314_s7 }
 0x333   : > { %v980_v19 = vpop.permute.xlu2 %979 }
 0x334   : > { %v981_v20 = vsel %vm975_vm12, %v980_v19, %v969_v12 }
 0x335   : > { %984 = vrot.lane.b32.xlu1 %v981_v20, %s3314_s7  ;;  %1016 = vrot.lane.b32.xlu0 %v1011_v18, %s3316_s4 }
 0x33b   : > { %v993_v21 = vpop.permute.xlu2 %992 }
 0x343   : > { %v995_v22 = vpop.permute.xlu2 %994 }
 0x34b   : > { %v1015_v23 = vpop.permute.xlu2 %1014 }
 0x39f   : > { %v983_v24 = vpop.permute.xlu0 %982 }
 0x3a0   : > { %v986_v25 = vsel %vm975_vm12, %v983_v24, %v3623_v10 }
 0x3a1   : > { %v998_v26 = vmul.f32 %v993_v21, %v986_v25  ;;  %v1020_v27 = vmul.f32 %v1015_v23, %v986_v25 }
 0x3a3   : > { %1002 = vrot.lane.b32.xlu2 %v998_v26, %s3317_s26  ;;  %1024 = vrot.lane.b32.xlu0 %v1020_v27, %s3318_s22 }
 0x3a7   : > { %v985_v28 = vpop.permute.xlu1 %984  ;;  %v1017_v29 = vpop.permute.xlu0 %1016 }
 0x3a8   : > { %v987_v31 = vsel %vm975_vm12, %v985_v28, %v969_v12 }
 0x3a9   : > { %v999_v32 = vmul.f32 %v995_v22, %v987_v31  ;;  %v1021_v33 = vmul.f32 %v1017_v29, %v987_v31 }
 0x3ab   : > { %1026 = vrot.lane.b32.xlu2 %v1021_v33, %s3318_s22  ;;  %1004 = vrot.lane.b32.xlu1 %v999_v32, %s3317_s26  ;;  %s3321_s26 = smov 120   ;;  %s3322_s22 = smov 96  }
 0x3fd   : > { %v1003_v34 = vpop.permute.xlu2 %1002 }
 0x3fe   : > { %v1008_v41 = vadd.f32 %v1003_v34, %v973_v37 }
 0x405   : > { %v1027_v43 = vpop.permute.xlu2 %1026 }
 0x415   : > { %v1025_v39 = vpop.permute.xlu0 %1024 }
 0x416   : > { %v1030_v44 = vadd.f32 %v1025_v39, %v1008_v41 }
 0x418   : > { %v1055_v57 = vrot.slane %v1030_v44, 4 }
 0x41d   : > { %v1005_v40 = vpop.permute.xlu1 %1004 }
 0x41e   : > { %v1009_v42 = vadd.f32 %v1005_v40, %v974_v38 }
 0x420   : > { %v1031_v45 = vadd.f32 %v1027_v43, %v1009_v42 }
 0x422   : > { %v3078_v46 = vpack.i.bf16 %v1031_v45, %v1030_v44  ;;  %v1111_v58 = vrot.slane %v1031_v45, 4 }
 0x424   : > { %3079 = vrot.lane.b32.xlu2 %v3078_v46, %s3319_s24  ;;  %3074 = vrot.lane.b32.xlu0 %v3078_v46, %s3320_s0 }
 0x425   : > { %3069 = vrot.lane.b32.xlu1 %v3078_v46, %s3321_s26 }
 0x42d   : > { %3084 = vrot.lane.b32.xlu1 %v3078_v46, %s3322_s22 }
 0x47e   : > { %v3080_v47 = vpop.permute.xlu2 %3079 }
 0x47f   : > { %v3082_v48 = vunpack.i.h.bf16 %v3080_v47  ;;  %v3081_v49 = vunpack.i.l.bf16 %v3080_v47  ;;  %3099 = vrot.lane.b32.xlu1 %v3080_v47, %s3322_s22 }
 0x481   : > { %v1121_v63 = vrot.slane %v3082_v48, 4  ;;  %v1065_v0 = vrot.slane %v3081_v49, 4 }
 0x487   : > { %3114 = vrot.lane.b32.xlu1 %v3660_v50, %s3319_s24  ;;  %s4272_s24 = scalar_lea.vmem %s4196_s8, %s3505_s28 }
 0x496   : > { %v3075_v56 = vpop.permute.xlu0 %3074 }
 0x497   : > { %v3077_v59 = vunpack.i.h.bf16 %v3075_v56  ;;  %v3076_v60 = vunpack.i.l.bf16 %v3075_v56  ;;  %v3070_v62 = vpop.permute.xlu1 %3069  ;;  %3094 = vrot.lane.b32.xlu2 %v3075_v56, %s3322_s22 }
 0x498   : > { %v3072_v1 = vunpack.i.h.bf16 %v3070_v62  ;;  %v3071_v2 = vunpack.i.l.bf16 %v3070_v62  ;;  %3089 = vrot.lane.b32.xlu0 %v3070_v62, %s3322_s22 }
 0x499   : > { %v1109_v3 = vrot.slane %v3077_v59, 4  ;;  %v1112_v4 = vsel %vm1053_vm13, %v3077_v59, %v1111_v58  ;;  %v1052_v5 = vrot.slane %v3076_v60, 4  ;;  %v1056_v6 = vsel %vm1053_vm13, %v3076_v60, %v1055_v57 }
 0x49a   : > { %v1120_v7 = vperm.slane %v1112_v4, %v3663_v55  ;;  %v1064_v8 = vperm.slane %v1056_v6, %v3663_v55  ;;  %v1122_v9 = vsel %vm1053_vm13, %v1121_v63, %v3072_v1  ;;  %v1123_v10 = vrot.slane %v3072_v1, 4 }
 0x49b   : > { %v1110_v11 = vsel %vm1053_vm13, %v1109_v3, %v1031_v45  ;;  %v1054_v12 = vsel %vm1053_vm13, %v1052_v5, %v1030_v44  ;;  %v1128_v13 = vperm.slane %v1122_v9, %v3663_v55  ;;  %v1066_v14 = vsel %vm1053_vm13, %v1065_v0, %v3071_v2 }
 0x49c   : > { %v1116_v15 = vperm.slane %v1110_v11, %v3663_v55  ;;  %v1147_v16 = vrot.slane %v1120_v7, 4  ;;  %v1060_v17 = vperm.slane %v1054_v12, %v3663_v55  ;;  %v1091_v18 = vrot.slane %v1064_v8, 4 }
 0x49d   : > { %v1124_v19 = vsel %vm1053_vm13, %v3082_v48, %v1123_v10  ;;  %v1133_v20 = vrot.slane %v1128_v13, 4  ;;  %v1067_v21 = vrot.slane %v3071_v2, 4  ;;  %v1072_v22 = vperm.slane %v1066_v14, %v3663_v55 }
 0x49e   : > { %v1135_v23 = vrot.slane %v1116_v15, 4  ;;  %v1079_v24 = vrot.slane %v1060_v17, 4  ;;  %v1132_v25 = vperm.slane %v1124_v19, %v3663_v55 }
 0x49f   : > { %v1134_v26 = vsel %vm1053_vm13, %v1133_v20, %v1116_v15  ;;  %v1068_v27 = vsel %vm1053_vm13, %v3081_v49, %v1067_v21  ;;  %v1077_v28 = vrot.slane %v1072_v22, 4  ;;  %3109 = vrot.lane.b32.xlu2 %v3660_v50, %s3320_s0 }
 0x4a0   : > { %v1136_v29 = vsel %vm1053_vm13, %v1128_v13, %v1135_v23  ;;  %v1140_v31 = vperm.slane %v1134_v26, %v3665_v61  ;;  %v1145_v32 = vrot.slane %v1132_v25, 4  ;;  %v1148_v33 = vsel %vm1053_vm13, %v1132_v25, %v1147_v16  ;;  %3104 = vrot.lane.b32.xlu0 %v3660_v50, %s3321_s26  ;;  %s4273_s26 = scalar_lea.vmem %s4199_s11, %s3505_s28 }
 0x4a1   : > { %v1144_v34 = vperm.slane %v1136_v29, %v3665_v61  ;;  %v1156_v35 = vperm.slane %v1148_v33, %v3665_v61  ;;  %v1076_v36 = vperm.slane %v1068_v27, %v3663_v55  ;;  %v1078_v37 = vsel %vm1053_vm13, %v1077_v28, %v1060_v17 }
 0x4a2   : > { %v1146_v38 = vsel %vm1053_vm13, %v1145_v32, %v1120_v7  ;;  %v1157_v39 = vrot.slane %v1140_v31, 4  ;;  %v1080_v40 = vsel %vm1053_vm13, %v1072_v22, %v1079_v24  ;;  %v1084_v44 = vperm.slane %v1078_v37, %v3665_v61 }
 0x4a3   : > { %v1152_v41 = vperm.slane %v1146_v38, %v3665_v61  ;;  %v1159_v42 = vrot.slane %v1144_v34, 4  ;;  %v1163_v43 = vrot.slane %v1156_v35, 4  ;;  %v1088_v45 = vperm.slane %v1080_v40, %v3665_v61 }
 0x4a4   : > { %v1089_v46 = vrot.slane %v1076_v36, 4  ;;  %v1092_v47 = vsel %vm1053_vm13, %v1076_v36, %v1091_v18  ;;  %v1158_v57 = vsel %vm1053_vm13, 0.0, %v1157_v39  ;;  %v1101_v60 = vrot.slane %v1084_v44, 4 }
 0x4a5   : > { %v1160_v48 = vsel %vm1053_vm13, 0.0, %v1159_v42  ;;  %v1161_v49 = vrot.slane %v1152_v41, 4  ;;  %v1164_v51 = vsel %vm1053_vm13, 0.0, %v1163_v43  ;;  %v1219_v52 = vsel %vm1053_vm13, %v1159_v42, %v1140_v31 }
 0x4a6   : > { %v1223_v53 = vperm.slane %v1219_v52, %v3663_v55  ;;  %v1224_v54 = vrot.slane %v1160_v48, 4  ;;  %v1230_v56 = vsel %vm1053_vm13, %v1163_v43, %v1152_v41  ;;  %v1090_v58 = vsel %vm1053_vm13, %v1089_v46, %v1064_v8 }
 0x4a7   : > { %v1100_v59 = vperm.slane %v1092_v47, %v3665_v61  ;;  %v1235_v63 = vrot.slane %v1164_v51, 4  ;;  %v1096_v0 = vperm.slane %v1090_v58, %v3665_v61  ;;  %v1103_v1 = vrot.slane %v1088_v45, 4 }
 0x4a8   : > { %v1225_v62 = vsel %vm1053_vm13, %v1224_v54, %v1158_v57  ;;  %v1162_v2 = vsel %vm1053_vm13, 0.0, %v1161_v49  ;;  %v1243_v4 = vrot.slane %v1223_v53, 4  ;;  %v1234_v9 = vperm.slane %v1230_v56, %v3663_v55  ;;  %3119 = vrot.lane.b32.xlu0 %v3660_v50, %s3314_s7 }
 0x4a9   : > { %v1229_v3 = vperm.slane %v1225_v62, %v3663_v55  ;;  %v1107_v5 = vrot.slane %v1100_v59, 4  ;;  %v1104_v6 = vsel %vm1053_vm13, 0.0, %v1103_v1  ;;  %v1105_v7 = vrot.slane %v1096_v0, 4 }
 0x4aa   : > { %v1165_v8 = vsel %vm1053_vm13, %v1103_v1, %v1084_v44  ;;  %v1170_v12 = vrot.slane %v1104_v6, 4  ;;  %v1102_v14 = vsel %vm1053_vm13, 0.0, %v1101_v60  ;;  %v1236_v20 = vsel %vm1053_vm13, %v1235_v63, %v1162_v2 }
 0x4ab   : > { %v1108_v10 = vsel %vm1053_vm13, 0.0, %v1107_v5  ;;  %v1169_v11 = vperm.slane %v1165_v8, %v3663_v55  ;;  %v1176_v13 = vsel %vm1053_vm13, %v1107_v5, %v1096_v0  ;;  %v1106_v15 = vsel %vm1053_vm13, 0.0, %v1105_v7 }
 0x4ac   : > { %v1181_v16 = vrot.slane %v1108_v10, 4  ;;  %v1171_v17 = vsel %vm1053_vm13, %v1170_v12, %v1102_v14  ;;  %v1180_v19 = vperm.slane %v1176_v13, %v3663_v55  ;;  %v1240_v23 = vperm.slane %v1236_v20, %v3663_v55 }
 0x4ad   : > { %v1189_v18 = vrot.slane %v1169_v11, 4  ;;  %v1175_v21 = vperm.slane %v1171_v17, %v3663_v55  ;;  %v1244_v24 = vsel %vm1053_vm13, %v1229_v3, %v1243_v4  ;;  %v1255_v28 = vrot.slane %v1234_v9, 4 }
 0x4ae   : > { %v1182_v22 = vsel %vm1053_vm13, %v1181_v16, %v1106_v15  ;;  %v1201_v26 = vrot.slane %v1180_v19, 4  ;;  %v1252_v27 = vperm.slane %v1244_v24, %v3665_v61  ;;  %v1241_v32 = vrot.slane %v1229_v3, 4 }
 0x4af   : > { %v1186_v25 = vperm.slane %v1182_v22, %v3663_v55  ;;  %v1190_v29 = vsel %vm1053_vm13, %v1175_v21, %v1189_v18  ;;  %v1187_v31 = vrot.slane %v1175_v21, 4  ;;  %v1253_v33 = vrot.slane %v1240_v23, 4  ;;  %v3085_v22 = vpop.permute.xlu1 %3084 }
 0x4b0   : > { %v1198_v34 = vperm.slane %v1190_v29, %v3665_v61  ;;  %v1256_v36 = vsel %vm1053_vm13, %v1240_v23, %v1255_v28  ;;  %v1271_v37 = vrot.slane %v1252_v27, 4  ;;  %v1242_v44 = vsel %vm1053_vm13, %v1241_v32, %v1223_v53 }
 0x4b1   : > { %v1202_v35 = vsel %vm1053_vm13, %v1186_v25, %v1201_v26  ;;  %v1264_v39 = vperm.slane %v1256_v36, %v3665_v61  ;;  %v1188_v40 = vsel %vm1053_vm13, %v1187_v31, %v1169_v11  ;;  %v1199_v41 = vrot.slane %v1186_v25, 4 }
 0x4b2   : > { %v1210_v38 = vperm.slane %v1202_v35, %v3665_v61  ;;  %v1217_v42 = vrot.slane %v1198_v34, 4  ;;  %v1194_v43 = vperm.slane %v1188_v40, %v3665_v61  ;;  %v1254_v50 = vsel %vm1053_vm13, %v1253_v33, %v1234_v9 }
 0x4b3   : > { %v1272_v45 = vsel %vm1053_vm13, %v1264_v39, %v1271_v37  ;;  %v1200_v46 = vsel %vm1053_vm13, %v1199_v41, %v1180_v19  ;;  %v1248_v47 = vperm.slane %v1242_v44, %v3665_v61  ;;  %v1260_v48 = vperm.slane %v1254_v50, %v3665_v61 }
 0x4b4   : > { %v1218_v49 = vsel %vm1053_vm13, %v1210_v38, %v1217_v42  ;;  %v1280_v51 = vpack.c.bf16 %v1272_v45, %v1272_v45  ;;  %v1206_v52 = vperm.slane %v1200_v46, %v3665_v61  ;;  %v1213_v54 = vrot.slane %v1194_v43, 4 }
 0x4b5   : > { %v1279_v56 = vpack.c.bf16 %v1218_v49, %v1218_v49  ;;  %v1267_v57 = vrot.slane %v1248_v47, 4  ;;  %v1215_v58 = vrot.slane %v1210_v38, 4  ;;  %v1269_v53 = vrot.slane %v1264_v39, 4 }
 0x4b6   : > { %v3749_v59 = vunpack.c.l.b16 %v1280_v51  ;;  %v1214_v60 = vsel %vm1053_vm13, %v1206_v52, %v1213_v54  ;;  %v1211_v62 = vrot.slane %v1206_v52, 4  ;;  %v1265_v63 = vrot.slane %v1260_v48, 4 }
 0x4b7   : > { %v3752_v0 = vunpack.c.l.b16 %v1279_v56  ;;  %v1268_v1 = vsel %vm1053_vm13, %v1260_v48, %v1267_v57  ;;  %v1275_v2 = vpack.c.bf16 %v1214_v60, %v1214_v60  ;;  %v1216_v3 = vsel %vm1053_vm13, %v1215_v58, %v1198_v34 }
 0x4b8   : > { %v1276_v4 = vpack.c.bf16 %v1268_v1, %v1268_v1  ;;  %v1270_v5 = vsel %vm1053_vm13, %v1269_v53, %v1252_v27  ;;  %v1277_v6 = vpack.c.bf16 %v1216_v3, %v1216_v3  ;;  %v1212_v7 = vsel %vm1053_vm13, %v1211_v62, %v1194_v43 }
 0x4b9   : > { %v1894_v8 = vpack.c.b16 %v3749_v59, %v3752_v0  ;;  %v3760_v9 = vunpack.c.l.b16 %v1275_v2  ;;  %v1278_v10 = vpack.c.bf16 %v1270_v5, %v1270_v5  ;;  %v1266_v11 = vsel %vm1053_vm13, %v1265_v63, %v1248_v47 }
 0x4ba   : > { %v3763_v12 = vunpack.c.l.b16 %v1276_v4  ;;  %v3765_v13 = vunpack.c.l.b16 %v1277_v6  ;;  %v1273_v14 = vpack.c.bf16 %v1212_v7, %v1212_v7  ;;  %v1274_v15 = vpack.c.bf16 %v1266_v11, %v1266_v11 }
 0x4bb   : > { %v3767_v16 = vunpack.c.l.b16 %v1278_v10  ;;  %v3087_v29 = vunpack.i.h.bf16 %v3085_v22  ;;  %v3086_v31 = vunpack.i.l.bf16 %v3085_v22 }
 0x4bc   : > { %v1834_v17 = vpack.c.b16 %v3763_v12, %v3760_v9  ;;  %v3771_v18 = vunpack.c.l.b16 %v1273_v14  ;;  %v3773_v19 = vunpack.c.l.b16 %v1274_v15 }
 0x4bd   : > { %v1864_v20 = vpack.c.b16 %v3767_v16, %v3765_v13  ;;  %v1363_v34 = vrot.slane %v3087_v29, 4  ;;  %v1307_v37 = vrot.slane %v3086_v31, 4 }
 0x4be   : > { %v1803_v21 = vpack.c.b16 %v3773_v19, %v3771_v18 }
 0x4f1   : > { %v3100_v23 = vpop.permute.xlu1 %3099  ;;  %v3095_v24 = vpop.permute.xlu2 %3094 }
 0x4f2   : > { %v3097_v27 = vunpack.i.h.bf16 %v3095_v24  ;;  %v3096_v28 = vunpack.i.l.bf16 %v3095_v24  ;;  %v3102_v35 = vunpack.i.h.bf16 %v3100_v23  ;;  %v3101_v36 = vunpack.i.l.bf16 %v3100_v23 }
 0x4f4   : > { %v1361_v32 = vrot.slane %v3097_v27, 4  ;;  %v1305_v33 = vrot.slane %v3096_v28, 4  ;;  %v1364_v40 = vsel %vm1053_vm13, %v3097_v27, %v1363_v34  ;;  %v1308_v41 = vsel %vm1053_vm13, %v3096_v28, %v1307_v37 }
 0x4f5   : > { %v1373_v43 = vrot.slane %v3102_v35, 4  ;;  %v1317_v44 = vrot.slane %v3101_v36, 4  ;;  %v1372_v46 = vperm.slane %v1364_v40, %v3663_v55  ;;  %v1316_v49 = vperm.slane %v1308_v41, %v3663_v55 }
 0x4f6   : > { %v1362_v38 = vsel %vm1053_vm13, %v1361_v32, %v3087_v29  ;;  %v1306_v39 = vsel %vm1053_vm13, %v1305_v33, %v3086_v31 }
 0x4f7   : > { %v1368_v42 = vperm.slane %v1362_v38, %v3663_v55  ;;  %v1312_v45 = vperm.slane %v1306_v39, %v3663_v55  ;;  %v1399_v62 = vrot.slane %v1372_v46, 4  ;;  %v1343_v6 = vrot.slane %v1316_v49, 4 }
 0x4f9   : > { %v3115_v25 = vpop.permute.xlu1 %3114  ;;  %v3110_v26 = vpop.permute.xlu2 %3109  ;;  %v1387_v57 = vrot.slane %v1368_v42, 4  ;;  %v1331_v60 = vrot.slane %v1312_v45, 4 }
 0x4fa   : > { %3134 = vrot.lane.b32.xlu0 %v3115_v25, %s3314_s7  ;;  %3129 = vrot.lane.b32.xlu1 %v3110_v26, %s3314_s7 }
 0x50a   : > { %v3090_v50 = vpop.permute.xlu0 %3089 }
 0x50b   : > { %v3092_v47 = vunpack.i.h.bf16 %v3090_v50  ;;  %v3091_v48 = vunpack.i.l.bf16 %v3090_v50 }
 0x50d   : > { %v1374_v51 = vsel %vm1053_vm13, %v1373_v43, %v3092_v47  ;;  %v1375_v52 = vrot.slane %v3092_v47, 4  ;;  %v1318_v54 = vsel %vm1053_vm13, %v1317_v44, %v3091_v48  ;;  %v1319_v56 = vrot.slane %v3091_v48, 4 }
 0x50e   : > { %v1380_v58 = vperm.slane %v1374_v51, %v3663_v55  ;;  %v1324_v53 = vperm.slane %v1318_v54, %v3663_v55 }
 0x50f   : > { %v1376_v63 = vsel %vm1053_vm13, %v3102_v35, %v1375_v52  ;;  %v1320_v1 = vsel %vm1053_vm13, %v3101_v36, %v1319_v56 }
 0x510   : > { %v1384_v2 = vperm.slane %v1376_v63, %v3663_v55  ;;  %v1385_v3 = vrot.slane %v1380_v58, 4  ;;  %v1388_v4 = vsel %vm1053_vm13, %v1380_v58, %v1387_v57  ;;  %v1328_v5 = vperm.slane %v1320_v1, %v3663_v55 }
 0x511   : > { %v1396_v7 = vperm.slane %v1388_v4, %v3665_v61  ;;  %v1329_v10 = vrot.slane %v1324_v53, 4  ;;  %v1332_v11 = vsel %vm1053_vm13, %v1324_v53, %v1331_v60 }
 0x512   : > { %v1386_v14 = vsel %vm1053_vm13, %v1385_v3, %v1368_v42  ;;  %v1397_v15 = vrot.slane %v1384_v2, 4  ;;  %v1400_v22 = vsel %vm1053_vm13, %v1384_v2, %v1399_v62  ;;  %v1340_v23 = vperm.slane %v1332_v11, %v3665_v61  ;;  %v3105_v39 = vpop.permute.xlu0 %3104 }
 0x513   : > { %v1392_v24 = vperm.slane %v1386_v14, %v3665_v61  ;;  %v1408_v25 = vperm.slane %v1400_v22, %v3665_v61  ;;  %v1411_v26 = vrot.slane %v1396_v7, 4  ;;  %v1330_v27 = vsel %vm1053_vm13, %v1329_v10, %v1312_v45  ;;  %3124 = vrot.lane.b32.xlu2 %v3105_v39, %s3314_s7  ;;  %s4271_s7 = sld [smem:[#allocation20_spill]] }
 0x514   : > { %v1398_v28 = vsel %vm1053_vm13, %v1397_v15, %v1372_v46  ;;  %v1336_v29 = vperm.slane %v1330_v27, %v3665_v61  ;;  %v1341_v31 = vrot.slane %v1328_v5, 4  ;;  %v1344_v32 = vsel %vm1053_vm13, %v1328_v5, %v1343_v6 }
 0x515   : > { %v1404_v33 = vperm.slane %v1398_v28, %v3665_v61  ;;  %v1409_v34 = vrot.slane %v1392_v24, 4  ;;  %v1412_v35 = vsel %vm1053_vm13, 0.0, %v1411_v26  ;;  %v1415_v36 = vrot.slane %v1408_v25, 4 }
 0x516   : > { %v1342_v37 = vsel %vm1053_vm13, %v1341_v31, %v1316_v49  ;;  %v1352_v38 = vperm.slane %v1344_v32, %v3665_v61  ;;  %v1471_v42 = vsel %vm1053_vm13, %v1411_v26, %v1392_v24  ;;  %v1476_v43 = vrot.slane %v1412_v35, 4 }
 0x517   : > { %v1410_v40 = vsel %vm1053_vm13, 0.0, %v1409_v34  ;;  %v1416_v41 = vsel %vm1053_vm13, 0.0, %v1415_v36  ;;  %v1413_v44 = vrot.slane %v1404_v33, 4  ;;  %v1348_v50 = vperm.slane %v1342_v37, %v3665_v61 }
 0x518   : > { %v1353_v45 = vrot.slane %v1336_v29, 4  ;;  %v1355_v46 = vrot.slane %v1340_v23, 4  ;;  %v1487_v47 = vrot.slane %v1416_v41, 4  ;;  %v1359_v48 = vrot.slane %v1352_v38, 4 }
 0x519   : > { %v1357_v52 = vrot.slane %v1348_v50, 4  ;;  %v1475_v53 = vperm.slane %v1471_v42, %v3663_v55  ;;  %v1414_v63 = vsel %vm1053_vm13, 0.0, %v1413_v44  ;;  %v1477_v4 = vsel %vm1053_vm13, %v1476_v43, %v1410_v40 }
 0x51a   : > { %v1354_v51 = vsel %vm1053_vm13, 0.0, %v1353_v45  ;;  %v1356_v49 = vsel %vm1053_vm13, 0.0, %v1355_v46  ;;  %v1417_v54 = vsel %vm1053_vm13, %v1355_v46, %v1336_v29  ;;  %v1360_v56 = vsel %vm1053_vm13, 0.0, %v1359_v48 }
 0x51b   : > { %v1421_v57 = vperm.slane %v1417_v54, %v3663_v55  ;;  %v1422_v58 = vrot.slane %v1356_v49, 4  ;;  %v1433_v60 = vrot.slane %v1360_v56, 4  ;;  %v1358_v62 = vsel %vm1053_vm13, 0.0, %v1357_v52 }
 0x51c   : > { %v1428_v2 = vsel %vm1053_vm13, %v1359_v48, %v1348_v50  ;;  %v1481_v10 = vperm.slane %v1477_v4, %v3663_v55  ;;  %v1482_v11 = vsel %vm1053_vm13, %v1415_v36, %v1404_v33  ;;  %v1488_v14 = vsel %vm1053_vm13, %v1487_v47, %v1414_v63 }
 0x51d   : > { %v1423_v1 = vsel %vm1053_vm13, %v1422_v58, %v1354_v51  ;;  %v1441_v3 = vrot.slane %v1421_v57, 4  ;;  %v1432_v6 = vperm.slane %v1428_v2, %v3663_v55  ;;  %v1434_v7 = vsel %vm1053_vm13, %v1433_v60, %v1358_v62 }
 0x51e   : > { %v1427_v5 = vperm.slane %v1423_v1, %v3663_v55  ;;  %v1438_v15 = vperm.slane %v1434_v7, %v3663_v55  ;;  %v1486_v24 = vperm.slane %v1482_v11, %v3663_v55  ;;  %v1492_v26 = vperm.slane %v1488_v14, %v3663_v55 }
 0x51f   : > { %v1453_v23 = vrot.slane %v1432_v6, 4  ;;  %v1495_v27 = vrot.slane %v1475_v53, 4  ;;  %v1493_v33 = vrot.slane %v1481_v10, 4 }
 0x520   : > { %v1442_v22 = vsel %vm1053_vm13, %v1427_v5, %v1441_v3  ;;  %v1439_v28 = vrot.slane %v1427_v5, 4  ;;  %v1507_v31 = vrot.slane %v1486_v24, 4  ;;  %v1451_v32 = vrot.slane %v1438_v15, 4 }
 0x521   : > { %v1450_v25 = vperm.slane %v1442_v22, %v3665_v61  ;;  %v1454_v29 = vsel %vm1053_vm13, %v1438_v15, %v1453_v23  ;;  %v1496_v36 = vsel %vm1053_vm13, %v1481_v10, %v1495_v27  ;;  %v1494_v50 = vsel %vm1053_vm13, %v1493_v33, %v1475_v53 }
 0x522   : > { %v1462_v34 = vperm.slane %v1454_v29, %v3665_v61  ;;  %v1440_v37 = vsel %vm1053_vm13, %v1439_v28, %v1421_v57  ;;  %v1504_v38 = vperm.slane %v1496_v36, %v3665_v61  ;;  %v1508_v39 = vsel %vm1053_vm13, %v1492_v26, %v1507_v31 }
 0x523   : > { %v1469_v35 = vrot.slane %v1450_v25, 4  ;;  %v1446_v40 = vperm.slane %v1440_v37, %v3665_v61  ;;  %v1452_v41 = vsel %vm1053_vm13, %v1451_v32, %v1432_v6  ;;  %v1516_v43 = vperm.slane %v1508_v39, %v3665_v61  ;;  %v3120_v39 = vpop.permute.xlu0 %3119 }
 0x524   : > { %v1458_v44 = vperm.slane %v1452_v41, %v3665_v61  ;;  %v1523_v45 = vrot.slane %v1504_v38, 4  ;;  %v1500_v48 = vperm.slane %v1494_v50, %v3665_v61  ;;  %v1505_v51 = vrot.slane %v1492_v26, 4 }
 0x525   : > { %v1470_v42 = vsel %vm1053_vm13, %v1462_v34, %v1469_v35  ;;  %v1465_v47 = vrot.slane %v1446_v40, 4  ;;  %v1467_v49 = vrot.slane %v1462_v34, 4  ;;  %v1521_v52 = vrot.slane %v1516_v43, 4 }
 0x526   : > { %v1531_v46 = vpack.c.bf16 %v1470_v42, %v1470_v42  ;;  %v1463_v54 = vrot.slane %v1458_v44, 4  ;;  %v1524_v56 = vsel %vm1053_vm13, %v1516_v43, %v1523_v45  ;;  %v1519_v60 = vrot.slane %v1500_v48, 4 }
 0x527   : > { %v1466_v58 = vsel %vm1053_vm13, %v1458_v44, %v1465_v47  ;;  %v1532_v62 = vpack.c.bf16 %v1524_v56, %v1524_v56  ;;  %v1506_v63 = vsel %vm1053_vm13, %v1505_v51, %v1486_v24  ;;  %v1468_v53 = vsel %vm1053_vm13, %v1467_v49, %v1450_v25 }
 0x528   : > { %v1897_v57 = vunpack.c.l.b16 %v1531_v46  ;;  %v1527_v1 = vpack.c.bf16 %v1466_v58, %v1466_v58  ;;  %v1512_v2 = vperm.slane %v1506_v63, %v3665_v61  ;;  %v1522_v3 = vsel %vm1053_vm13, %v1521_v52, %v1504_v38 }
 0x529   : > { %v1529_v4 = vpack.c.bf16 %v1468_v53, %v1468_v53  ;;  %v1464_v5 = vsel %vm1053_vm13, %v1463_v54, %v1446_v40  ;;  %v1898_v6 = vunpack.c.l.b16 %v1532_v62  ;;  %v1530_v7 = vpack.c.bf16 %v1522_v3, %v1522_v3 }
 0x52a   : > { %v1525_v10 = vpack.c.bf16 %v1464_v5, %v1464_v5  ;;  %v1520_v11 = vsel %vm1053_vm13, %v1512_v2, %v1519_v60  ;;  %v1517_v15 = vrot.slane %v1512_v2, 4  ;;  %v1837_v24 = vunpack.c.l.b16 %v1527_v1 }
 0x52b   : > { %v1867_v14 = vunpack.c.l.b16 %v1529_v4  ;;  %v1899_v22 = vpack.c.b16 %v1898_v6, %v1897_v57  ;;  %v1528_v23 = vpack.c.bf16 %v1520_v11, %v1520_v11  ;;  %v1868_v26 = vunpack.c.l.b16 %v1530_v7 }
 0x52c   : > { %v1518_v25 = vsel %vm1053_vm13, %v1517_v15, %v1500_v48  ;;  %v1806_v27 = vunpack.c.l.b16 %v1525_v10  ;;  %v3122_v40 = vunpack.i.h.bf16 %v3120_v39  ;;  %v3121_v59 = vunpack.i.l.bf16 %v3120_v39 }
 0x52d   : > { %v1904_v28 = vsel %vm1809_vm14, %v1899_v22, 0  ;;  %v1838_v29 = vunpack.c.l.b16 %v1528_v23  ;;  %v1869_v31 = vpack.c.b16 %v1868_v26, %v1867_v14  ;;  %v1526_v32 = vpack.c.bf16 %v1518_v25, %v1518_v25 }
 0x52e   : > { %1913 = vmatpush.bf16.xpose.msrb.mxu0 %v1904_v28  ;;  %v1629_v13 = vrot.slane %v3122_v40, 4  ;;  %v1573_v43 = vrot.slane %v3121_v59, 4 }
 0x52f   : > { %v1839_v33 = vpack.c.b16 %v1838_v29, %v1837_v24  ;;  %v1874_v34 = vsel %vm1809_vm14, %v1869_v31, 0  ;;  %v1807_v35 = vunpack.c.l.b16 %v1526_v32 }
 0x530   : > { %1883 = vmatpush.bf16.xpose.msra.mxu3 %v1874_v34 }
 0x531   : > { %v1844_v36 = vsel %vm1809_vm14, %v1839_v33, 0  ;;  %v1808_v37 = vpack.c.b16 %v1807_v35, %v1806_v27 }
 0x532   : > { %1853 = vmatpush.bf16.xpose.msra.mxu2 %v1844_v36 }
 0x533   : > { %v1814_v38 = vsel %vm1809_vm14, %v1808_v37, 0 }
 0x534   : > { %1823 = vmatpush.bf16.xpose.msra.mxu1 %v1814_v38 }
 0x535   : > { %2907 = vmatmul.msk.bf16.vlgmr.msrb.gmra.mxu0 %vm1809_vm14, %v1894_v8 }
 0x537   : > { %2906 = vmatmul.msk.bf16.vlgmr.msra.gmra.mxu3 %vm1809_vm14, %v1864_v20 }
 0x539   : > { %2905 = vmatmul.msk.bf16.vlgmr.msra.gmra.mxu2 %vm1809_vm14, %v1834_v17 }
 0x53b   : > { %2904 = vmatmul.msk.bf16.vlgmr.msra.gmra.mxu1 %vm1809_vm14, %v1803_v21 }
 0x56c   : > { %v3135_v0 = vpop.permute.xlu0 %3134  ;;  %v3130_v8 = vpop.permute.xlu1 %3129 }
 0x56d   : > { %v3132_v41 = vunpack.i.h.bf16 %v3130_v8  ;;  %v3131_v42 = vunpack.i.l.bf16 %v3130_v8  ;;  %v3137_v16 = vunpack.i.h.bf16 %v3135_v0  ;;  %v3136_v20 = vunpack.i.l.bf16 %v3135_v0  ;;  %v3125_v48 = vpop.permute.xlu2 %3124 }
 0x56e   : > { %v3127_v49 = vunpack.i.h.bf16 %v3125_v48  ;;  %v3126_v52 = vunpack.i.l.bf16 %v3125_v48 }
 0x56f   : > { %v1627_v44 = vrot.slane %v3132_v41, 4  ;;  %v1571_v9 = vrot.slane %v3131_v42, 4  ;;  %v1630_v12 = vsel %vm1053_vm13, %v3132_v41, %v1629_v13  ;;  %v1574_v18 = vsel %vm1053_vm13, %v3131_v42, %v1573_v43 }
 0x570   : > { %v1639_v45 = vrot.slane %v3137_v16, 4  ;;  %v1583_v46 = vrot.slane %v3136_v20, 4  ;;  %v1638_v47 = vperm.slane %v1630_v12, %v3663_v55  ;;  %v1582_v51 = vperm.slane %v1574_v18, %v3663_v55 }
 0x571   : > { %v1572_v17 = vsel %vm1053_vm13, %v1571_v9, %v3121_v59  ;;  %v1628_v19 = vsel %vm1053_vm13, %v1627_v44, %v3122_v40  ;;  %v1641_v58 = vrot.slane %v3127_v49, 4  ;;  %v1585_v62 = vrot.slane %v3126_v52, 4 }
 0x572   : > { %v1578_v21 = vperm.slane %v1572_v17, %v3663_v55  ;;  %v1634_v50 = vperm.slane %v1628_v19, %v3663_v55  ;;  %v1640_v57 = vsel %vm1053_vm13, %v1639_v45, %v3127_v49  ;;  %v1584_v60 = vsel %vm1053_vm13, %v1583_v46, %v3126_v52 }
 0x573   : > { %v1665_v63 = vrot.slane %v1638_v47, 4  ;;  %v1646_v1 = vperm.slane %v1640_v57, %v3663_v55  ;;  %v1590_v53 = vperm.slane %v1584_v60, %v3663_v55  ;;  %v1609_v2 = vrot.slane %v1582_v51, 4 }
 0x574   : > { %v1597_v54 = vrot.slane %v1578_v21, 4  ;;  %v1653_v56 = vrot.slane %v1634_v50, 4  ;;  %v1642_v3 = vsel %vm1053_vm13, %v3137_v16, %v1641_v58  ;;  %v1586_v4 = vsel %vm1053_vm13, %v3136_v20, %v1585_v62 }
 0x575   : > { %v1650_v5 = vperm.slane %v1642_v3, %v3663_v55  ;;  %v1651_v6 = vrot.slane %v1646_v1, 4  ;;  %v1594_v10 = vperm.slane %v1586_v4, %v3663_v55  ;;  %v1595_v14 = vrot.slane %v1590_v53, 4 }
 0x576   : > { %v1654_v7 = vsel %vm1053_vm13, %v1646_v1, %v1653_v56  ;;  %v1598_v15 = vsel %vm1053_vm13, %v1590_v53, %v1597_v54 }
 0x577   : > { %v1662_v11 = vperm.slane %v1654_v7, %v3665_v61  ;;  %v1652_v22 = vsel %vm1053_vm13, %v1651_v6, %v1634_v50  ;;  %v1663_v23 = vrot.slane %v1650_v5, 4  ;;  %v1666_v24 = vsel %vm1053_vm13, %v1650_v5, %v1665_v63 }
 0x578   : > { %v1606_v26 = vperm.slane %v1598_v15, %v3665_v61  ;;  %v1658_v25 = vperm.slane %v1652_v22, %v3665_v61  ;;  %v1674_v27 = vperm.slane %v1666_v24, %v3665_v61  ;;  %v1596_v29 = vsel %vm1053_vm13, %v1595_v14, %v1578_v21 }
 0x579   : > { %v1677_v28 = vrot.slane %v1662_v11, 4  ;;  %v1664_v31 = vsel %vm1053_vm13, %v1663_v23, %v1638_v47  ;;  %v1602_v32 = vperm.slane %v1596_v29, %v3665_v61  ;;  %v1607_v33 = vrot.slane %v1594_v10, 4 }
 0x57a   : > { %v1610_v34 = vsel %vm1053_vm13, %v1594_v10, %v1609_v2  ;;  %v1670_v35 = vperm.slane %v1664_v31, %v3665_v61  ;;  %v1675_v36 = vrot.slane %v1658_v25, 4  ;;  %v1681_v38 = vrot.slane %v1674_v27, 4 }
 0x57b   : > { %v1678_v37 = vsel %vm1053_vm13, 0.0, %v1677_v28  ;;  %v1608_v40 = vsel %vm1053_vm13, %v1607_v33, %v1582_v51  ;;  %v1618_v59 = vperm.slane %v1610_v34, %v3665_v61  ;;  %v1619_v0 = vrot.slane %v1602_v32, 4 }
 0x57c   : > { %v1742_v39 = vrot.slane %v1678_v37, 4  ;;  %v1679_v8 = vrot.slane %v1670_v35, 4  ;;  %v1682_v41 = vsel %vm1053_vm13, 0.0, %v1681_v38  ;;  %v1614_v42 = vperm.slane %v1608_v40, %v3665_v61 }
 0x57d   : > { %v1621_v13 = vrot.slane %v1606_v26, 4  ;;  %v1753_v16 = vrot.slane %v1682_v41, 4  ;;  %v1625_v20 = vrot.slane %v1618_v59, 4  ;;  %v1620_v43 = vsel %vm1053_vm13, 0.0, %v1619_v0 }
 0x57e   : > { %v1676_v44 = vsel %vm1053_vm13, 0.0, %v1675_v36  ;;  %v1623_v12 = vrot.slane %v1614_v42, 4  ;;  %v1680_v17 = vsel %vm1053_vm13, 0.0, %v1679_v8  ;;  %v1737_v51 = vsel %vm1053_vm13, %v1677_v28, %v1658_v25 }
 0x57f   : > { %v1622_v9 = vsel %vm1053_vm13, 0.0, %v1621_v13  ;;  %v1683_v18 = vsel %vm1053_vm13, %v1621_v13, %v1602_v32  ;;  %v1626_v19 = vsel %vm1053_vm13, 0.0, %v1625_v20  ;;  %v1694_v45 = vsel %vm1053_vm13, %v1625_v20, %v1614_v42 }
 0x580   : > { %v1688_v21 = vrot.slane %v1622_v9, 4  ;;  %v1687_v50 = vperm.slane %v1683_v18, %v3663_v55  ;;  %v1699_v46 = vrot.slane %v1626_v19, 4  ;;  %v1624_v47 = vsel %vm1053_vm13, 0.0, %v1623_v12 }
 0x581   : > { %v1698_v48 = vperm.slane %v1694_v45, %v3663_v55  ;;  %v1741_v54 = vperm.slane %v1737_v51, %v3663_v55  ;;  %v1743_v56 = vsel %vm1053_vm13, %v1742_v39, %v1676_v44  ;;  %v1748_v1 = vsel %vm1053_vm13, %v1681_v38, %v1670_v35 }
 0x582   : > { %v1689_v49 = vsel %vm1053_vm13, %v1688_v21, %v1620_v43  ;;  %v1707_v52 = vrot.slane %v1687_v50, 4  ;;  %v1700_v58 = vsel %vm1053_vm13, %v1699_v46, %v1624_v47  ;;  %v1747_v62 = vperm.slane %v1743_v56, %v3663_v55 }
 0x583   : > { %v1693_v57 = vperm.slane %v1689_v49, %v3663_v55  ;;  %v1719_v60 = vrot.slane %v1698_v48, 4  ;;  %v1704_v63 = vperm.slane %v1700_v58, %v3663_v55  ;;  %v1754_v53 = vsel %vm1053_vm13, %v1753_v16, %v1680_v17 }
 0x584   : > { %v1761_v2 = vrot.slane %v1741_v54, 4  ;;  %v1752_v4 = vperm.slane %v1748_v1, %v3663_v55  ;;  %v1758_v5 = vperm.slane %v1754_v53, %v3663_v55  ;;  %v1759_v28 = vrot.slane %v1747_v62, 4 }
 0x585   : > { %v1708_v3 = vsel %vm1053_vm13, %v1693_v57, %v1707_v52  ;;  %v1705_v6 = vrot.slane %v1693_v57, 4  ;;  %v1720_v10 = vsel %vm1053_vm13, %v1704_v63, %v1719_v60  ;;  %v1717_v14 = vrot.slane %v1704_v63, 4 }
 0x586   : > { %v1716_v7 = vperm.slane %v1708_v3, %v3665_v61  ;;  %v1762_v11 = vsel %vm1053_vm13, %v1747_v62, %v1761_v2  ;;  %v1728_v15 = vperm.slane %v1720_v10, %v3665_v61  ;;  %v1773_v23 = vrot.slane %v1752_v4, 4 }
 0x587   : > { %v1770_v22 = vperm.slane %v1762_v11, %v3665_v61  ;;  %v1706_v24 = vsel %vm1053_vm13, %v1705_v6, %v1687_v50  ;;  %v1718_v27 = vsel %vm1053_vm13, %v1717_v14, %v1698_v48  ;;  %v1760_v35 = vsel %vm1053_vm13, %v1759_v28, %v1741_v54 }
 0x588   : > { %v1735_v26 = vrot.slane %v1716_v7, 4  ;;  %v1712_v25 = vperm.slane %v1706_v24, %v3665_v61  ;;  %v1733_v29 = vrot.slane %v1728_v15, 4  ;;  %v1774_v31 = vsel %vm1053_vm13, %v1758_v5, %v1773_v23 }
 0x589   : > { %v1789_v32 = vrot.slane %v1770_v22, 4  ;;  %v1724_v33 = vperm.slane %v1718_v27, %v3665_v61  ;;  %v1782_v34 = vperm.slane %v1774_v31, %v3665_v61  ;;  %v1771_v36 = vrot.slane %v1758_v5, 4 }
 0x58a   : > { %v1736_v37 = vsel %vm1053_vm13, %v1728_v15, %v1735_v26  ;;  %v1734_v38 = vsel %vm1053_vm13, %v1733_v29, %v1716_v7  ;;  %v1766_v40 = vperm.slane %v1760_v35, %v3665_v61  ;;  %v1731_v17 = vrot.slane %v1712_v25, 4 }
 0x58b   : > { %v1729_v39 = vrot.slane %v1724_v33, 4  ;;  %v1797_v59 = vpack.c.bf16 %v1736_v37, %v1736_v37  ;;  %v1787_v0 = vrot.slane %v1782_v34, 4  ;;  %v1795_v8 = vpack.c.bf16 %v1734_v38, %v1734_v38 }
 0x58c   : > { %v1772_v41 = vsel %vm1053_vm13, %v1771_v36, %v1752_v4  ;;  %v1790_v42 = vsel %vm1053_vm13, %v1782_v34, %v1789_v32  ;;  %v1785_v50 = vrot.slane %v1766_v40, 4  ;;  %v1732_v45 = vsel %vm1053_vm13, %v1724_v33, %v1731_v17 }
 0x58d   : > { %v1730_v13 = vsel %vm1053_vm13, %v1729_v39, %v1712_v25  ;;  %v1778_v16 = vperm.slane %v1772_v41, %v3665_v61  ;;  %v1798_v20 = vpack.c.bf16 %v1790_v42, %v1790_v42  ;;  %v2100_v43 = vunpack.c.l.b16 %v1797_v59 }
 0x58e   : > { %v1788_v44 = vsel %vm1053_vm13, %v1787_v0, %v1770_v22  ;;  %v2072_v9 = vunpack.c.l.b16 %v1795_v8  ;;  %v1791_v12 = vpack.c.bf16 %v1730_v13, %v1730_v13  ;;  %v1793_v54 = vpack.c.bf16 %v1732_v45, %v1732_v45 }
 0x58f   : > { %v1796_v18 = vpack.c.bf16 %v1788_v44, %v1788_v44  ;;  %v1783_v19 = vrot.slane %v1778_v16, 4  ;;  %v2101_v21 = vunpack.c.l.b16 %v1798_v20  ;;  %v1786_v51 = vsel %vm1053_vm13, %v1778_v16, %v1785_v50 }
 0x590   : > { %v2016_v52 = vunpack.c.l.b16 %v1791_v12  ;;  %v1794_v56 = vpack.c.bf16 %v1786_v51, %v1786_v51  ;;  %v2044_v60 = vunpack.c.l.b16 %v1793_v54 }
 0x591   : > { %v2073_v46 = vunpack.c.l.b16 %v1796_v18  ;;  %v1784_v47 = vsel %vm1053_vm13, %v1783_v19, %v1766_v40  ;;  %v2102_v48 = vpack.c.b16 %v2101_v21, %v2100_v43 }
 0x592   : > { %v1792_v49 = vpack.c.bf16 %v1784_v47, %v1784_v47  ;;  %v2045_v62 = vunpack.c.l.b16 %v1794_v56 }
 0x593   : > { %v2074_v57 = vpack.c.b16 %v2073_v46, %v2072_v9  ;;  %2114 = vmatpush.bf16.msra.mxu0 %v2102_v48 }
 0x594   : > { %v2017_v58 = vunpack.c.l.b16 %v1792_v49  ;;  %v2046_v1 = vpack.c.b16 %v2045_v62, %v2044_v60 }
 0x595   : > { %2086 = vmatpush.bf16.msrb.mxu3 %v2074_v57 }
 0x596   : > { %v2018_v63 = vpack.c.b16 %v2017_v58, %v2016_v52  ;;  %2058 = vmatpush.bf16.msrb.mxu2 %v2046_v1 }
 0x598   : > { %2030 = vmatpush.bf16.msrb.mxu1 %v2018_v63 }
 0x5b2   : > { %v1915_v6 = vpop.f32.mrf.mxu0 }
 0x5b3   : > { %v1926_v33 = vmul.f32 0.35355338, %v1915_v6 }
 0x5b5   : > { %v1947_v35 = vsel %vm1928_vm15, %v1926_v33, -inf }
 0x5b8   : > { %v1825_v53 = vpop.f32.mrf.mxu1 }
 0x5b9   : > { %v1920_v2 = vmul.f32 0.35355338, %v1825_v53 }
 0x5ba   : > { %v1885_v3 = vpop.f32.mrf.mxu3  ;;  %v1917_v28 = vpop.f32.mrf.mxu0 }
 0x5bb   : > { %v1924_v4 = vmul.f32 0.35355338, %v1885_v3  ;;  %v1929_v5 = vsel %vm1928_vm15, %v1920_v2, -inf  ;;  %v1927_v32 = vmul.f32 0.35355338, %v1917_v28 }
 0x5bc   : > { %v1855_v7 = vpop.f32.mrf.mxu2  ;;  %1930 = vmax.xlane.f32.xlu1 %v1929_v5 }
 0x5bd   : > { %v1922_v10 = vmul.f32 0.35355338, %v1855_v7  ;;  %v1941_v11 = vsel %vm1928_vm15, %v1924_v4, -inf  ;;  %v1950_v34 = vsel %vm1928_vm15, %v1927_v32, -inf }
 0x5be   : > { %1942 = vmax.xlane.f32.xlu2 %v1941_v11 }
 0x5bf   : > { %v1935_v14 = vsel %vm1928_vm15, %v1922_v10, -inf }
 0x5c0   : > { %1936 = vmax.xlane.f32.xlu0 %v1935_v14  ;;  %v1827_v15 = vpop.f32.mrf.mxu1 }
 0x5c1   : > { %v1921_v23 = vmul.f32 0.35355338, %v1827_v15 }
 0x5c2   : > { %v1887_v22 = vpop.f32.mrf.mxu3 }
 0x5c3   : > { %v1925_v24 = vmul.f32 0.35355338, %v1887_v22  ;;  %v1932_v31 = vsel %vm1928_vm15, %v1921_v23, -inf }
 0x5c4   : > { %v1857_v26 = vpop.f32.mrf.mxu2 }
 0x5c5   : > { %v1923_v25 = vmul.f32 0.35355338, %v1857_v26  ;;  %v1944_v27 = vsel %vm1928_vm15, %v1925_v24, -inf }
 0x5c6   : > { %1945 = vmax.xlane.f32.xlu1 %v1944_v27 }
 0x5c7   : > { %v1938_v29 = vsel %vm1928_vm15, %v1923_v25, -inf }
 0x5c8   : > { %1939 = vmax.xlane.f32.xlu2 %v1938_v29  ;;  %1933 = vmax.xlane.f32.xlu0 %v1932_v31 }
 0x5ce   : > { %1951 = vmax.xlane.f32.xlu1 %v1950_v34 }
 0x5d0   : > { %1948 = vmax.xlane.f32.xlu2 %v1947_v35 }
 0x62f   : > { %v1931_v36 = vpop.xlane.xlu1 %1930 }
 0x630   : > { %v1953_v37 = vsub.f32 %v1920_v2, %v1931_v36 }
 0x631   : > { %v1943_v38 = vpop.xlane.xlu2 %1942 }
 0x632   : > { %v1961_v39 = vmul.f32 1.442695, %v1953_v37  ;;  %v1957_v40 = vsub.f32 %v1924_v4, %v1943_v38 }
 0x633   : > { %v1937_v59 = vpop.xlane.xlu0 %1936 }
 0x634   : > { %3167 = vpow2.f32 %v1961_v39  ;;  %v1969_v0 = vmul.f32 1.442695, %v1957_v40  ;;  %v1955_v8 = vsub.f32 %v1922_v10, %v1937_v59 }
 0x636   : > { %3169 = vpow2.f32 %v1969_v0  ;;  %v1965_v41 = vmul.f32 1.442695, %v1955_v8 }
 0x638   : > { %3171 = vpow2.f32 %v1965_v41 }
 0x639   : > { %v1946_v42 = vpop.xlane.xlu1 %1945 }
 0x63a   : > { %v3168_v13 = vpop.eup %3167  ;;  %v1958_v16 = vsub.f32 %v1925_v24, %v1946_v42 }
 0x63b   : > { %v1940_v20 = vpop.xlane.xlu2 %1939  ;;  %v1934_v43 = vpop.xlane.xlu0 %1933  ;;  %v1977_v44 = vsel %vm1928_vm15, %v3168_v13, 0.0  ;;  %v2001_v60 = vpack.c.bf16 %v3168_v13, %v3168_v13 }
 0x63c   : > { %v3170_v9 = vpop.eup %3169  ;;  %v1956_v12 = vsub.f32 %v1923_v25, %v1940_v20  ;;  %v1971_v17 = vmul.f32 1.442695, %v1958_v16  ;;  %v1954_v18 = vsub.f32 %v1921_v23, %v1934_v43  ;;  %1978 = vadd.xlane.f32.xlu1 %v1977_v44 }
 0x63d   : > { %v1989_v19 = vsel %vm1928_vm15, %v3170_v9, 0.0  ;;  %v2005_v48 = vpack.c.bf16 %v3170_v9, %v3170_v9  ;;  %v2011_v10 = vunpack.c.l.b16 %v2001_v60 }
 0x63e   : > { %v1967_v21 = vmul.f32 1.442695, %v1956_v12  ;;  %3173 = vpow2.f32 %v1971_v17  ;;  %v1963_v50 = vmul.f32 1.442695, %v1954_v18  ;;  %1990 = vadd.xlane.f32.xlu0 %v1989_v19  ;;  %v3172_v46 = vpop.eup %3171 }
 0x63f   : > { %v2003_v56 = vpack.c.bf16 %v3172_v46, %v3172_v46  ;;  %v2067_v1 = vunpack.c.l.b16 %v2005_v48  ;;  %v1983_v29 = vsel %vm1928_vm15, %v3172_v46, 0.0 }
 0x640   : > { %3175 = vpow2.f32 %v1967_v21 }
 0x641   : > { %3177 = vpow2.f32 %v1963_v50  ;;  %v1952_v45 = vpop.xlane.xlu1 %1951  ;;  %v2039_v5 = vunpack.c.l.b16 %v2003_v56 }
 0x642   : > { %v1960_v47 = vsub.f32 %v1927_v32, %v1952_v45 }
 0x643   : > { %v1949_v51 = vpop.xlane.xlu2 %1948 }
 0x644   : > { %v3174_v49 = vpop.eup %3173  ;;  %v1959_v52 = vsub.f32 %v1926_v33, %v1949_v51  ;;  %v1975_v54 = vmul.f32 1.442695, %v1960_v47 }
 0x645   : > { %v2006_v57 = vpack.c.bf16 %v3174_v49, %v3174_v49  ;;  %v1992_v33 = vsel %vm1928_vm15, %v3174_v49, 0.0 }
 0x646   : > { %v3176_v58 = vpop.eup %3175  ;;  %v1973_v62 = vmul.f32 1.442695, %v1959_v52  ;;  %3179 = vpow2.f32 %v1975_v54 }
 0x647   : > { %v3178_v63 = vpop.eup %3177  ;;  %v2004_v53 = vpack.c.bf16 %v3176_v58, %v3176_v58  ;;  %v2068_v2 = vunpack.c.l.b16 %v2006_v57  ;;  %v1986_v34 = vsel %vm1928_vm15, %v3176_v58, 0.0 }
 0x648   : > { %v2002_v3 = vpack.c.bf16 %v3178_v63, %v3178_v63  ;;  %3181 = vpow2.f32 %v1973_v62  ;;  %v1980_v4 = vsel %vm1928_vm15, %v3178_v63, 0.0 }
 0x649   : > { %v2040_v6 = vunpack.c.l.b16 %v2004_v53  ;;  %1981 = vadd.xlane.f32.xlu0 %v1980_v4  ;;  %v2069_v7 = vpack.c.b16 %v2068_v2, %v2067_v1 }
 0x64a   : > { %v2012_v11 = vunpack.c.l.b16 %v2002_v3 }
 0x64b   : > { %v2041_v14 = vpack.c.b16 %v2040_v6, %v2039_v5  ;;  %2910 = vmatmul.msk.bf16.vlgmr.msrb.gmra.mxu3 %vm1928_vm15, %v2069_v7 }
 0x64c   : > { %v3180_v15 = vpop.eup %3179  ;;  %v2013_v22 = vpack.c.b16 %v2012_v11, %v2011_v10 }
 0x64d   : > { %v2008_v23 = vpack.c.bf16 %v3180_v15, %v3180_v15  ;;  %2909 = vmatmul.msk.bf16.vlgmr.msrb.gmra.mxu2 %vm1928_vm15, %v2041_v14  ;;  %v1998_v24 = vsel %vm1928_vm15, %v3180_v15, 0.0 }
 0x64e   : > { %v3182_v26 = vpop.eup %3181  ;;  %2908 = vmatmul.msk.bf16.vlgmr.msrb.gmra.mxu1 %vm1928_vm15, %v2013_v22  ;;  %1999 = vadd.xlane.f32.xlu1 %v1998_v24 }
 0x64f   : > { %v2007_v25 = vpack.c.bf16 %v3182_v26, %v3182_v26  ;;  %v2096_v27 = vunpack.c.l.b16 %v2008_v23  ;;  %v1995_v28 = vsel %vm1928_vm15, %v3182_v26, 0.0 }
 0x650   : > { %1996 = vadd.xlane.f32.xlu2 %v1995_v28 }
 0x651   : > { %v2095_v31 = vunpack.c.l.b16 %v2007_v25  ;;  %1984 = vadd.xlane.f32.xlu0 %v1983_v29 }
 0x653   : > { %v2097_v32 = vpack.c.b16 %v2096_v27, %v2095_v31 }
 0x655   : > { %2911 = vmatmul.msk.bf16.vlgmr.msra.gmra.mxu0 %vm1928_vm15, %v2097_v32 }
 0x658   : > { %1993 = vadd.xlane.f32.xlu2 %v1992_v33 }
 0x660   : > { %1987 = vadd.xlane.f32.xlu2 %v1986_v34 }
 0x6af   : > { %v1979_v37 = vpop.xlane.xlu1 %1978 }
 0x6b0   : > { %3183 = vrcp.f32 %v1979_v37 }
 0x6b1   : > { %v1991_v35 = vpop.xlane.xlu0 %1990 }
 0x6b2   : > { %3185 = vrcp.f32 %v1991_v35 }
 0x6b6   : > { %v3184_v40 = vpop.eup %3183 }
 0x6b8   : > { %v3186_v41 = vpop.eup %3185 }
 0x6bc   : > { %v1982_v36 = vpop.xlane.xlu0 %1981 }
 0x6c1   : > { %v2000_v18 = vpop.xlane.xlu1 %1999 }
 0x6c3   : > { %v1997_v38 = vpop.xlane.xlu2 %1996 }
 0x6c4   : > { %v1985_v39 = vpop.xlane.xlu0 %1984 }
 0x6c5   : > { %3187 = vrcp.f32 %v1985_v39 }
 0x6c6   : > { %3189 = vrcp.f32 %v1997_v38 }
 0x6c7   : > { %3191 = vrcp.f32 %v1982_v36 }
 0x6cb   : > { %v2032_v59 = vpop.f32.mrf.mxu1  ;;  %v1994_v0 = vpop.xlane.xlu2 %1993 }
 0x6cc   : > { %v2129_v8 = vmul.f32 %v3184_v40, %v2032_v59  ;;  %v3188_v20 = vpop.eup %3187  ;;  %3193 = vrcp.f32 %v1994_v0 }
 0x6cd   : > { %v3190_v17 = vpop.eup %3189 }
 0x6ce   : > { %v2088_v42 = vpop.f32.mrf.mxu3  ;;  %v2139_v13 = vrot.slane %v2129_v8, 4  ;;  %v3192_v50 = vpop.eup %3191 }
 0x6cf   : > { %v2133_v16 = vmul.f32 %v3186_v41, %v2088_v42 }
 0x6d0   : > { %v2060_v43 = vpop.f32.mrf.mxu2 }
 0x6d1   : > { %v2131_v44 = vmul.f32 %v3188_v20, %v2060_v43  ;;  %v2137_v9 = vrot.slane %v2133_v16, 4  ;;  %v2140_v12 = vsel %vm1053_vm13, %v2133_v16, %v2139_v13 }
 0x6d2   : > { %v2148_v19 = vperm.slane %v2140_v12, %v3663_v55  ;;  %v2116_v21 = vpop.f32.mrf.mxu0  ;;  %v3194_v58 = vpop.eup %3193 }
 0x6d3   : > { %v2151_v45 = vrot.slane %v2131_v44, 4  ;;  %v2138_v46 = vsel %vm1053_vm13, %v2137_v9, %v2129_v8  ;;  %v2034_v47 = vpop.f32.mrf.mxu1  ;;  %v2135_v48 = vmul.f32 %v3190_v17, %v2116_v21  ;;  %v1988_v51 = vpop.xlane.xlu2 %1987 }
 0x6d4   : > { %v2144_v49 = vperm.slane %v2138_v46, %v3663_v55  ;;  %v2175_v52 = vrot.slane %v2148_v19, 4  ;;  %v2130_v54 = vmul.f32 %v3192_v50, %v2034_v47  ;;  %3195 = vrcp.f32 %v1988_v51 }
 0x6d5   : > { %3197 = vrcp.f32 %v2000_v18  ;;  %v2149_v56 = vrot.slane %v2135_v48, 4  ;;  %v2152_v57 = vsel %vm1053_vm13, %v2135_v48, %v2151_v45 }
 0x6d6   : > { %v2163_v60 = vrot.slane %v2144_v49, 4  ;;  %v2160_v62 = vperm.slane %v2152_v57, %v3663_v55  ;;  %v2090_v63 = vpop.f32.mrf.mxu3  ;;  %v2195_v1 = vrot.slane %v2130_v54, 4 }
 0x6d7   : > { %v2150_v53 = vsel %vm1053_vm13, %v2149_v56, %v2131_v44  ;;  %v2134_v2 = vmul.f32 %v3194_v58, %v2090_v63 }
 0x6d8   : > { %v2156_v3 = vperm.slane %v2150_v53, %v3663_v55  ;;  %v2173_v4 = vrot.slane %v2160_v62, 4  ;;  %v2176_v5 = vsel %vm1053_vm13, %v2160_v62, %v2175_v52  ;;  %v2062_v23 = vpop.f32.mrf.mxu2 }
 0x6d9   : > { %v2184_v6 = vperm.slane %v2176_v5, %v3665_v61  ;;  %v2193_v7 = vrot.slane %v2134_v2, 4  ;;  %v2196_v10 = vsel %vm1053_vm13, %v2134_v2, %v2195_v1 }
 0x6da   : > { %v3196_v11 = vpop.eup %3195  ;;  %v2161_v14 = vrot.slane %v2156_v3, 4  ;;  %v2164_v15 = vsel %vm1053_vm13, %v2156_v3, %v2163_v60  ;;  %v2174_v22 = vsel %vm1053_vm13, %v2173_v4, %v2148_v19  ;;  %v2204_v24 = vperm.slane %v2196_v10, %v3663_v55  ;;  %v2118_v26 = vpop.f32.mrf.mxu0 }
 0x6db   : > { %v3198_v25 = vpop.eup %3197  ;;  %v2172_v27 = vperm.slane %v2164_v15, %v3665_v61  ;;  %v2180_v28 = vperm.slane %v2174_v22, %v3665_v61  ;;  %v2191_v29 = vrot.slane %v2184_v6, 4  ;;  %v2132_v31 = vmul.f32 %v3196_v11, %v2062_v23 }
 0x6dc   : > { %v2162_v32 = vsel %vm1053_vm13, %v2161_v14, %v2144_v49  ;;  %v2194_v33 = vsel %vm1053_vm13, %v2193_v7, %v2130_v54  ;;  %v2231_v34 = vrot.slane %v2204_v24, 4  ;;  %v2136_v35 = vmul.f32 %v3198_v25, %v2118_v26 }
 0x6dd   : > { %v2168_v36 = vperm.slane %v2162_v32, %v3665_v61  ;;  %v2187_v37 = vrot.slane %v2172_v27, 4  ;;  %v2189_v38 = vrot.slane %v2180_v28, 4  ;;  %v2192_v39 = vsel %vm1053_vm13, 0.0, %v2191_v29 }
 0x6de   : > { %v2260_v40 = vsel %vm1053_vm13, %v2191_v29, %v2180_v28  ;;  %v2265_v59 = vrot.slane %v2192_v39, 4  ;;  %v2207_v0 = vrot.slane %v2132_v31, 4  ;;  %v2200_v8 = vperm.slane %v2194_v33, %v3663_v55 }
 0x6df   : > { %v2185_v41 = vrot.slane %v2168_v36, 4  ;;  %v2188_v42 = vsel %vm1053_vm13, 0.0, %v2187_v37  ;;  %v2190_v13 = vsel %vm1053_vm13, 0.0, %v2189_v38  ;;  %v2249_v16 = vsel %vm1053_vm13, %v2187_v37, %v2168_v36 }
 0x6e0   : > { %v2254_v20 = vrot.slane %v2188_v42, 4  ;;  %v2219_v43 = vrot.slane %v2200_v8, 4  ;;  %v2205_v44 = vrot.slane %v2136_v35, 4  ;;  %v2208_v9 = vsel %vm1053_vm13, %v2136_v35, %v2207_v0 }
 0x6e1   : > { %v2186_v12 = vsel %vm1053_vm13, 0.0, %v2185_v41  ;;  %v2216_v17 = vperm.slane %v2208_v9, %v3663_v55  ;;  %v2253_v18 = vperm.slane %v2249_v16, %v3663_v55  ;;  %v2264_v19 = vperm.slane %v2260_v40, %v3663_v55 }
 0x6e2   : > { %v2206_v21 = vsel %vm1053_vm13, %v2205_v44, %v2132_v31  ;;  %v2255_v50 = vsel %vm1053_vm13, %v2254_v20, %v2186_v12  ;;  %v2266_v45 = vsel %vm1053_vm13, %v2265_v59, %v2190_v13 }
 0x6e3   : > { %v2212_v46 = vperm.slane %v2206_v21, %v3663_v55  ;;  %v2229_v47 = vrot.slane %v2216_v17, 4  ;;  %v2232_v48 = vsel %vm1053_vm13, %v2216_v17, %v2231_v34  ;;  %v2259_v51 = vperm.slane %v2255_v50, %v3663_v55 }
 0x6e4   : > { %v2240_v49 = vperm.slane %v2232_v48, %v3665_v61  ;;  %v2270_v52 = vperm.slane %v2266_v45, %v3663_v55  ;;  %v2273_v54 = vrot.slane %v2253_v18, 4  ;;  %v2285_v56 = vrot.slane %v2264_v19, 4 }
 0x6e5   : > { %v2217_v57 = vrot.slane %v2212_v46, 4  ;;  %v2220_v58 = vsel %vm1053_vm13, %v2212_v46, %v2219_v43  ;;  %v2230_v60 = vsel %vm1053_vm13, %v2229_v47, %v2204_v24  ;;  %v2271_v4 = vrot.slane %v2259_v51, 4 }
 0x6e6   : > { %v2228_v62 = vperm.slane %v2220_v58, %v3665_v61  ;;  %v2236_v63 = vperm.slane %v2230_v60, %v3665_v61  ;;  %v2247_v1 = vrot.slane %v2240_v49, 4  ;;  %v2274_v53 = vsel %vm1053_vm13, %v2259_v51, %v2273_v54 }
 0x6e7   : > { %v2218_v2 = vsel %vm1053_vm13, %v2217_v57, %v2200_v8  ;;  %v2286_v3 = vsel %vm1053_vm13, %v2270_v52, %v2285_v56  ;;  %v2282_v15 = vperm.slane %v2274_v53, %v3665_v61  ;;  %v2272_v33 = vsel %vm1053_vm13, %v2271_v4, %v2253_v18 }
 0x6e8   : > { %v2224_v5 = vperm.slane %v2218_v2, %v3665_v61  ;;  %v2243_v6 = vrot.slane %v2228_v62, 4  ;;  %v2245_v7 = vrot.slane %v2236_v63, 4  ;;  %v2248_v10 = vsel %vm1053_vm13, 0.0, %v2247_v1  ;;  %v2962_v62 = vld [vmem:[%s4271_s7 + $0x8] sm:$0xff] }
 0x6e9   : > { %v2314_v11 = vsel %vm1053_vm13, %v2247_v1, %v2236_v63  ;;  %v2319_v14 = vrot.slane %v2248_v10, 4  ;;  %v2294_v27 = vperm.slane %v2286_v3, %v3665_v61  ;;  %v2301_v38 = vrot.slane %v2282_v15, 4  ;;  %2418 = vmatpush.bf16.msra.mxu1 %v2962_v62  ;;  %v2961_v63 = vld [vmem:[%s4271_s7] sm:$0xff] }
 0x6ea   : > { %v2241_v22 = vrot.slane %v2224_v5, 4  ;;  %v2244_v23 = vsel %vm1053_vm13, 0.0, %v2243_v6  ;;  %v2246_v24 = vsel %vm1053_vm13, 0.0, %v2245_v7  ;;  %v2303_v26 = vsel %vm1053_vm13, %v2243_v6, %v2224_v5  ;;  %v3158_v62 = vld [vmem:[%s788_s18] ss:$0 sm:$0xff] }
 0x6eb   : > { %v2308_v25 = vrot.slane %v2244_v23, 4  ;;  %v2307_v28 = vperm.slane %v2303_v26, %v3663_v55  ;;  %v2318_v29 = vperm.slane %v2314_v11, %v3663_v55  ;;  %v2320_v32 = vsel %vm1053_vm13, %v2319_v14, %v2246_v24 }
 0x6ec   : > { %v2242_v31 = vsel %vm1053_vm13, 0.0, %v2241_v22  ;;  %v2324_v35 = vperm.slane %v2320_v32, %v3663_v55  ;;  %v2283_v40 = vrot.slane %v2270_v52, 4  ;;  %v2299_v0 = vrot.slane %v2294_v27, 4 }
 0x6ed   : > { %v2309_v34 = vsel %vm1053_vm13, %v2308_v25, %v2242_v31  ;;  %v2327_v36 = vrot.slane %v2307_v28, 4  ;;  %v2339_v37 = vrot.slane %v2318_v29, 4  ;;  %v2278_v8 = vperm.slane %v2272_v33, %v3665_v61  ;;  %2419 = vmatpush.bf16.msra.mxu1 %v2961_v63  ;;  %v3156_v25 = vld [vmem:[%s4272_s24] ss:$0 sm:$0xff] }
 0x6ee   : > { %v2313_v39 = vperm.slane %v2309_v34, %v3663_v55  ;;  %v2337_v41 = vrot.slane %v2324_v35, 4  ;;  %v2284_v16 = vsel %vm1053_vm13, %v2283_v40, %v2264_v19  ;;  %v2302_v46 = vsel %vm1053_vm13, %v2294_v27, %v2301_v38 }
 0x6ef   : > { %v2340_v59 = vsel %vm1053_vm13, %v2324_v35, %v2339_v37  ;;  %v2290_v44 = vperm.slane %v2284_v16, %v3665_v61  ;;  %v2297_v50 = vrot.slane %v2278_v8, 4  ;;  %v2300_v19 = vsel %vm1053_vm13, %v2299_v0, %v2282_v15  ;;  %v3208_v35 = vld [vmem:[#allocation2 + $0x8] sm:$0xff] }
 0x6f0   : > { %v2328_v42 = vsel %vm1053_vm13, %v2313_v39, %v2327_v36  ;;  %v2348_v13 = vperm.slane %v2340_v59, %v3665_v61  ;;  %v2325_v20 = vrot.slane %v2313_v39, 4  ;;  %v2338_v55 = vsel %vm1053_vm13, %v2337_v41, %v2318_v29  ;;  %v3207_v29 = vld [vmem:[#allocation2] sm:$0xff] }
 0x6f1   : > { %v2336_v43 = vperm.slane %v2328_v42, %v3665_v61  ;;  %v2344_v17 = vperm.slane %v2338_v55, %v3665_v61  ;;  %v2295_v21 = vrot.slane %v2290_v44, 4  ;;  %v2964_v55 = vld [vmem:[%s3550_s21 + $0x8] sm:$0xff] }
 0x6f2   : > { %v2353_v9 = vrot.slane %v2348_v13, 4  ;;  %v2326_v12 = vsel %vm1053_vm13, %v2325_v20, %v2307_v28  ;;  %2514 = vmatpush.bf16.msra.mxu2 %v2964_v55 }
 0x6f3   : > { %v2355_v18 = vrot.slane %v2336_v43, 4  ;;  %v2332_v45 = vperm.slane %v2326_v12, %v3665_v61  ;;  %v2349_v48 = vrot.slane %v2344_v17, 4  ;;  %v2296_v54 = vsel %vm1053_vm13, %v2295_v21, %v2278_v8 }
 0x6f4   : > { %v2354_v47 = vsel %vm1053_vm13, %v2353_v9, %v2336_v43  ;;  %v2298_v61 = vsel %vm1053_vm13, %v2290_v44, %v2297_v50  ;;  %v2963_v9 = vld [vmem:[%s3550_s21] sm:$0xff] }
 0x6f5   : > { %v2356_v51 = vsel %vm1053_vm13, %v2348_v13, %v2355_v18  ;;  %v3143_v49 = vpack.i.bf16 %v2354_v47, %v2300_v19  ;;  %v2351_v52 = vrot.slane %v2332_v45, 4  ;;  %v2350_v57 = vsel %vm1053_vm13, %v2349_v48, %v2332_v45 }
 0x6f6   : > { %v3148_v56 = vpack.i.bf16 %v2356_v51, %v2302_v46  ;;  %2515 = vmatpush.bf16.msra.mxu2 %v2963_v9 }
 0x6f7   : > { %3144 = vrot.lane.b32.xlu0 %v3143_v49, %s3325_s2  ;;  %v2352_v58 = vsel %vm1053_vm13, %v2344_v17, %v2351_v52 }
 0x6f8   : > { %3149 = vrot.lane.b32.xlu2 %v3148_v56, %s3326_s20  ;;  %v3138_v60 = vpack.i.bf16 %v2352_v58, %v2298_v61 }
 0x6fa   : > { %3139 = vrot.lane.b32.xlu1 %v3138_v60, %s4229_s23 }
 0x752   : > { %v3150_v53 = vpop.permute.xlu2 %3149 }
 0x753   : > { %v3152_v7 = vunpack.i.h.bf16 %v3150_v53  ;;  %v3151_v10 = vunpack.i.l.bf16 %v3150_v53 }
 0x769   : > { %v3145_v1 = vpop.permute.xlu0 %3144 }
 0x76a   : > { %v3147_v5 = vunpack.i.h.bf16 %v3145_v1  ;;  %v3146_v6 = vunpack.i.l.bf16 %v3145_v1 }
 0x76c   : > { %v3140_v2 = vpop.permute.xlu1 %3139 }
 0x76d   : > { %v3142_v3 = vunpack.i.h.bf16 %v3140_v2  ;;  %v3141_v4 = vunpack.i.l.bf16 %v3140_v2 }
 0x76f   : > { %v2382_v11 = vsel %vm1809_vm14, %v2350_v57, %v3142_v3  ;;  %v2381_v14 = vsel %vm1809_vm14, %v2296_v54, %v3141_v4  ;;  %v3157_v57 = vld [vmem:[%s4273_s26] ss:$0 sm:$0xff] }
 0x770   : > { %v2384_v15 = vsel %vm1928_vm15, %v2382_v11, %v3147_v5  ;;  %v2383_v22 = vsel %vm1928_vm15, %v2381_v14, %v3146_v6  ;;  %v2968_v5 = vld [vmem:[%s3564_s27 + $0x18] sm:$0xff]  ;;  %v3159_v6 = vld [vmem:[%s796_s29] ss:$0 sm:$0xff]  ;;  %v2966_v14 = vld [vmem:[%s3564_s27 + $0x8] sm:$0xff]  ;;  %s4274_s29 = sld [smem:[#allocation9_spill]] }
 0x771   : > { %v2387_v23 = vsel %vm2385_vm0, %v2384_v15, %v3152_v7  ;;  %v2386_v24 = vsel %vm2385_vm0, %v2383_v22, %v3151_v10  ;;  %2585 = vmatpush.bf16.msra.mxu3 %v2968_v5  ;;  %v2967_v7 = vld [vmem:[%s3564_s27 + $0x10] sm:$0xff] }
 0x772   : > { %v2388_v26 = vpack.c.bf16 %v2387_v23, %v2386_v24  ;;  %v2965_v23 = vld [vmem:[%s3564_s27] sm:$0xff] }
 0x774   : > { %2920 = vmatmul.msk.bf16.vlgmr.msra.gmra.mxu1 %vm871_vm4, %v2388_v26 }
 0x775   : > { %2586 = vmatpush.bf16.msra.mxu3 %v2967_v7 }
 0x776   : > { %p2947_p1 = scmp.ge.s32.totalorder %s4274_s29, 1 }
 0x779   : > { %2587 = vmatpush.bf16.msra.mxu3 %v2966_v14 }
 0x77d   : > { %2588 = vmatpush.bf16.msra.mxu3 %v2965_v23 }
 0x7f1   : > { %v2421_v27 = vpop.f32.mrf.mxu1 }
 0x7f2   : > { %v2422_v28 = vadd.f32 %v3156_v25, %v2421_v27 }
 0x7f4   : > { %v4075_v31 = vadd.f32 %v3207_v29, %v2422_v28 }
 0x7f6   : > { %v2430_v32 = vsel %vm871_vm4, %v4075_v31, 0.0 }
 0x7f7   : > { %2431 = vadd.xlane.f32.xlu0 %v2430_v32 }
 0x7f9   : > { %v2423_v33 = vpop.f32.mrf.mxu1 }
 0x7fa   : > { %v2424_v34 = vadd.f32 %v3156_v25, %v2423_v33 }
 0x7fc   : > { %v4079_v36 = vadd.f32 %v3208_v35, %v2424_v34 }
 0x7fe   : > { %v2433_v37 = vsel %vm871_vm4, %v4079_v36, 0.0 }
 0x7ff   : > { %2434 = vadd.xlane.f32.xlu1 %v2433_v37 }
 0x86a   : > { %v2432_v38 = vpop.xlane.xlu0 %2431 }
 0x86b   : > { %v2436_v39 = vmul.f32 %v2432_v38, %v3597_v30 }
 0x86d   : > { %v2438_v40 = vsub.f32 %v4075_v31, %v2436_v39 }
 0x86f   : > { %v2440_v59 = vmul.f32 %v2438_v40, %v2438_v40 }
 0x871   : > { %v2442_v0 = vsel %vm871_vm4, %v2440_v59, 0.0 }
 0x872   : > { %v2435_v8 = vpop.xlane.xlu1 %2434  ;;  %2443 = vadd.xlane.f32.xlu2 %v2442_v0 }
 0x873   : > { %v2437_v41 = vmul.f32 %v2435_v8, %v3597_v30 }
 0x875   : > { %v2439_v42 = vsub.f32 %v4079_v36, %v2437_v41 }
 0x877   : > { %v2441_v13 = vmul.f32 %v2439_v42, %v2439_v42 }
 0x879   : > { %v2445_v16 = vsel %vm871_vm4, %v2441_v13, 0.0  ;;  %v3160_v13 = vld [vmem:[%s804_s5] ss:$0 sm:$0xff] }
 0x87a   : > { %2446 = vadd.xlane.f32.xlu0 %v2445_v16 }
 0x8e5   : > { %v2444_v20 = vpop.xlane.xlu2 %2443 }
 0x8e6   : > { %v2448_v43 = vmul.f32 %v2444_v20, %v3597_v30 }
 0x8e8   : > { %v2450_v44 = vadd.f32 1e-05, %v2448_v43 }
 0x8ea   : > { %3199 = vrsqrt.f32 %v2450_v44  ;;  %vm2458_vm2 = vweird.f32 %v2450_v44 }
 0x8ed   : > { %v2447_v12 = vpop.xlane.xlu0 %2446 }
 0x8ee   : > { %v2449_v17 = vmul.f32 %v2447_v12, %v3597_v30 }
 0x8f0   : > { %v3200_v18 = vpop.eup %3199  ;;  %v2451_v21 = vadd.f32 1e-05, %v2449_v17 }
 0x8f1   : > { %v2453_v50 = vmul.f32 %v3200_v18, %v2450_v44  ;;  %vm2459_vm1 = vweird.f32 %v3200_v18 }
 0x8f2   : > { %3201 = vrsqrt.f32 %v2451_v21  ;;  %vm2460_vm3 = vmor %vm2458_vm2, %vm2459_vm1  ;;  %vm2468_vm6 = vweird.f32 %v2451_v21 }
 0x8f3   : > { %v2454_v45 = vmul.f32 %v3200_v18, %v2453_v50 }
 0x8f5   : > { %v2455_v46 = vmul.f32 0.5, %v2454_v45 }
 0x8f7   : > { %v2456_v19 = vsub.f32 1.5, %v2455_v46 }
 0x8f8   : > { %v3202_v47 = vpop.eup %3201 }
 0x8f9   : > { %v2457_v48 = vmul.f32 %v3200_v18, %v2456_v19  ;;  %v2463_v51 = vmul.f32 %v3202_v47, %v2451_v21  ;;  %vm2469_vm5 = vweird.f32 %v3202_v47 }
 0x8fa   : > { %vm2470_vm7 = vmor %vm2468_vm6, %vm2469_vm5 }
 0x8fb   : > { %v2464_v49 = vmul.f32 %v3202_v47, %v2463_v51  ;;  %v2461_v52 = vsel %vm2460_vm3, %v3200_v18, %v2457_v48 }
 0x8fc   : > { %v2472_v61 = vmul.f32 %v2461_v52, %v2438_v40 }
 0x8fd   : > { %v2465_v54 = vmul.f32 0.5, %v2464_v49 }
 0x8fe   : > { %v2477_v63 = vmul.f32 %v3157_v57, %v2472_v61 }
 0x8ff   : > { %v2466_v56 = vsub.f32 1.5, %v2465_v54 }
 0x900   : > { %v2482_v2 = vadd.f32 %v3158_v62, %v2477_v63 }
 0x901   : > { %v2467_v58 = vmul.f32 %v3202_v47, %v2466_v56 }
 0x903   : > { %v2471_v60 = vsel %vm2470_vm7, %v3202_v47, %v2467_v58 }
 0x904   : > { %v2473_v1 = vmul.f32 %v2471_v60, %v2439_v42 }
 0x906   : > { %v2478_v53 = vmul.f32 %v3157_v57, %v2473_v1 }
 0x908   : > { %v2483_v3 = vadd.f32 %v3158_v62, %v2478_v53 }
 0x90a   : > { %v2484_v4 = vpack.c.bf16 %v2483_v3, %v2482_v2 }
 0x90c   : > { %2929 = vmatmul.msk.bf16.vlgmr.msra.gmra.mxu2 %vm871_vm4, %v2484_v4 }
 0x98f   : > { %v2517_v10 = vpop.f32.mrf.mxu2 }
 0x990   : > { %v2518_v11 = vadd.f32 %v3159_v6, %v2517_v10 }
 0x992   : > { %v2522_v15 = vmul.f32 %v2518_v11, %v2518_v11 }
 0x994   : > { %v2524_v22 = vmul.f32 %v2522_v15, %v2518_v11 }
 0x996   : > { %v2526_v24 = vmul.f32 0.044715, %v2524_v22 }
 0x997   : > { %v2519_v26 = vpop.f32.mrf.mxu2 }
 0x998   : > { %v2528_v25 = vadd.f32 %v2526_v24, %v2518_v11  ;;  %v2520_v27 = vadd.f32 %v3159_v6, %v2519_v26 }
 0x99a   : > { %v2530_v28 = vmul.f32 0.7978846, %v2528_v25  ;;  %v2523_v29 = vmul.f32 %v2520_v27, %v2520_v27 }
 0x99c   : > { %v2525_v32 = vmul.f32 %v2523_v29, %v2520_v27  ;;  %3203 = vtanh.f32 %v2530_v28 }
 0x99e   : > { %v2527_v33 = vmul.f32 0.044715, %v2525_v32 }
 0x9a0   : > { %v2529_v34 = vadd.f32 %v2527_v33, %v2520_v27 }
 0x9a2   : > { %v2531_v35 = vmul.f32 0.7978846, %v2529_v34  ;;  %v3204_v37 = vpop.eup %3203 }
 0x9a3   : > { %v2534_v38 = vadd.f32 1.0, %v3204_v37 }
 0x9a4   : > { %3205 = vtanh.f32 %v2531_v35 }
 0x9a5   : > { %v2536_v40 = vmul.f32 0.5, %v2534_v38 }
 0x9a7   : > { %v2538_v8 = vmul.f32 %v2536_v40, %v2518_v11 }
 0x9aa   : > { %v3206_v39 = vpop.eup %3205 }
 0x9ab   : > { %v2535_v59 = vadd.f32 1.0, %v3206_v39 }
 0x9ad   : > { %v2537_v0 = vmul.f32 0.5, %v2535_v59 }
 0x9af   : > { %v2539_v41 = vmul.f32 %v2537_v0, %v2520_v27 }
 0x9b1   : > { %v2540_v42 = vpack.c.bf16 %v2539_v41, %v2538_v8 }
 0x9b3   : > { %2946 = vmatmul.msk.bf16.vlgmr.msra.gmra.mxu3 %vm2577_vm8, %v2540_v42 }
 0xa36   : > { %v2590_v16 = vpop.f32.mrf.mxu3 }
 0xa37   : > { %v2591_v20 = vadd.f32 %v3160_v13, %v2590_v16 }
 0xa39   : > { %v2595_v43 = vadd.f32 %v2591_v20, %v4075_v31 }
 0xa3d   : > { %2600 = sbr.rel (%p2947_p1) target bundleno = 2628 (0xa44), region = 104 }
 0xa3e   : > { %v2592_v44 = vpop.f32.mrf.mxu3 }
 0xa3f   : > { %v2593_v55 = vadd.f32 %v3160_v13, %v2592_v44 }
 0xa41   : > { %v2596_v9 = vadd.f32 %v2593_v55, %v4079_v36 }
 0xa42   : > { %2601 = vst.msk [vmem:[#allocation2] sm:$0xff] %vm871_vm4, %v2595_v43 }
 0xa43   : > { %2602 = vst.msk [vmem:[#allocation2 + $0x8] sm:$0xff] %vm871_vm4, %v2596_v9 }
 0xa44 PF: > { %s4275_s30 = sld [smem:[#allocation9_spill]] }
 0xa4a   : > { %p2948_p2 = scmp.ne.s32.totalorder %s4275_s30, 1 }
 0xa4b   : > { %s4276_s4 = sld [smem:[#allocation28_spill]] (!%p2948_p2) }
 0xa4c   : > { %2606 = sbr.rel (%p2948_p2) target bundleno = 2918 (0xb66), region = 108  ;;  %s4277_s0 = sld [smem:[#allocation29_spill]] (!%p2948_p2) }
 0xa51   : > { %v2609_v12 = vsel %vm871_vm4, %v2595_v43, 0.0  ;;  %v2612_v31 = vsel %vm871_vm4, %v2596_v9, 0.0  ;;  %v3209_v3 = vld [vmem:[%s4276_s4] ss:$0 sm:$0xff] }
 0xa52   : > { %2610 = vadd.xlane.f32.xlu0 %v2609_v12  ;;  %v3210_v6 = vld [vmem:[%s4277_s0] ss:$0 sm:$0xff] }
 0xa5a   : > { %2613 = vadd.xlane.f32.xlu0 %v2612_v31 }
 0xac5   : > { %v2611_v17 = vpop.xlane.xlu0 %2610 }
 0xac6   : > { %v2615_v36 = vmul.f32 %v2611_v17, %v3597_v30 }
 0xac8   : > { %v2617_v18 = vsub.f32 %v2595_v43, %v2615_v36 }
 0xaca   : > { %v2619_v21 = vmul.f32 %v2617_v18, %v2617_v18 }
 0xacc   : > { %v2621_v50 = vsel %vm871_vm4, %v2619_v21, 0.0 }
 0xacd   : > { %2622 = vadd.xlane.f32.xlu1 %v2621_v50  ;;  %v2614_v45 = vpop.xlane.xlu0 %2613 }
 0xace   : > { %v2616_v46 = vmul.f32 %v2614_v45, %v3597_v30 }
 0xad0   : > { %v2618_v19 = vsub.f32 %v2596_v9, %v2616_v46 }
 0xad2   : > { %v2620_v47 = vmul.f32 %v2618_v19, %v2618_v19 }
 0xad4   : > { %v2624_v48 = vsel %vm871_vm4, %v2620_v47, 0.0 }
 0xad5   : > { %2625 = vadd.xlane.f32.xlu1 %v2624_v48 }
 0xb40   : > { %v2623_v51 = vpop.xlane.xlu1 %2622 }
 0xb41   : > { %v2627_v49 = vmul.f32 %v2623_v51, %v3597_v30 }
 0xb43   : > { %v2629_v52 = vadd.f32 1e-05, %v2627_v49 }
 0xb45   : > { %3211 = vrsqrt.f32 %v2629_v52  ;;  %vm2637_vm10 = vweird.f32 %v2629_v52 }
 0xb48   : > { %v2626_v54 = vpop.xlane.xlu1 %2625 }
 0xb49   : > { %v2628_v56 = vmul.f32 %v2626_v54, %v3597_v30 }
 0xb4b   : > { %v3212_v57 = vpop.eup %3211  ;;  %v2630_v61 = vadd.f32 1e-05, %v2628_v56 }
 0xb4c   : > { %v2632_v58 = vmul.f32 %v3212_v57, %v2629_v52  ;;  %vm2638_vm9 = vweird.f32 %v3212_v57 }
 0xb4d   : > { %3213 = vrsqrt.f32 %v2630_v61  ;;  %vm2639_vm11 = vmor %vm2637_vm10, %vm2638_vm9  ;;  %vm2647_vm13 = vweird.f32 %v2630_v61 }
 0xb4e   : > { %v2633_v60 = vmul.f32 %v3212_v57, %v2632_v58 }
 0xb50   : > { %v2634_v62 = vmul.f32 0.5, %v2633_v60 }
 0xb52   : > { %v2635_v63 = vsub.f32 1.5, %v2634_v62 }
 0xb53   : > { %v3214_v1 = vpop.eup %3213 }
 0xb54   : > { %v2636_v53 = vmul.f32 %v3212_v57, %v2635_v63  ;;  %v2642_v2 = vmul.f32 %v3214_v1, %v2630_v61  ;;  %vm2648_vm12 = vweird.f32 %v3214_v1 }
 0xb55   : > { %vm2649_vm14 = vmor %vm2647_vm13, %vm2648_vm12 }
 0xb56   : > { %v2640_v4 = vsel %vm2639_vm11, %v3212_v57, %v2636_v53  ;;  %v2643_v30 = vmul.f32 %v3214_v1, %v2642_v2 }
 0xb57   : > { %v2651_v5 = vmul.f32 %v2640_v4, %v2617_v18 }
 0xb58   : > { %v2644_v7 = vmul.f32 0.5, %v2643_v30 }
 0xb59   : > { %v2656_v10 = vmul.f32 %v3209_v3, %v2651_v5 }
 0xb5a   : > { %v2645_v11 = vsub.f32 1.5, %v2644_v7 }
 0xb5b   : > { %v2661_v14 = vadd.f32 %v3210_v6, %v2656_v10 }
 0xb5c   : > { %v2646_v15 = vmul.f32 %v3214_v1, %v2645_v11 }
 0xb5d   : > { %2663 = vst.msk [vmem:[%s3566_s1] sm:$0xff] %vm871_vm4, %v2661_v14 }
 0xb5e   : > { %v2650_v22 = vsel %vm2649_vm14, %v3214_v1, %v2646_v15 }
 0xb5f   : > { %v2652_v23 = vmul.f32 %v2650_v22, %v2618_v19 }
 0xb61   : > { %v2657_v24 = vmul.f32 %v3209_v3, %v2652_v23 }
 0xb63   : > { %v2662_v26 = vadd.f32 %v3210_v6, %v2657_v24 }
 0xb65   : > { %2664 = vst.msk [vmem:[%s3566_s1 + $0x8] sm:$0xff] %vm871_vm4, %v2662_v26 }
 0xb66 PF: > { %s4278_s26 = sld [smem:[#allocation10_spill]]  ;;  %s2678_s30 = sshll.u32 %s3566_s1, 4  ;;  %s2679_s30 = int_to_ptr.vmem [resolvable:$true] %s2678_s30 }
 0xb67   : > { %s4279_s22 = sld [smem:[#allocation7_spill]] }
 0xb68   : > { %s4281_s18 = sld [smem:[#allocation30_spill]] }
 0xb6c   : > { %s2969_s2 = sshll.u32 %s4278_s26, 4 }
 0xb6d   : > { %s4282_s28 = sand.u32 1, %s4279_s22  }
 0xb6e   : > { %s2677_s29 = scalar_lea.hbm %s4281_s18, %s2969_s2  ;;  %s2666_s4 = scalar_lea.sflag [#allocation4], %s4282_s28 }
 0xb6f   : > { %s2680_s5 = sshll.u32 %s2677_s29, 4  ;;  %s3235_s26 = scalar_lea.hbm %s4281_s18, 32  ;;  %s2681_s5 = int_to_ptr.hbm [resolvable:$true] %s2680_s5 }
 0xb70   : > { %s3229_s24 = sshra.s32 %s2681_s5, 4  ;;  %s3230_s24 = int_to_ptr.hbm [resolvable:$true] %s3229_s24 }
 0xb71   : > { %s3231_s21 = scalar_lea.hbm %s3230_s24, 16  ;;  %p3236_p7 = scmp.lt.s32.totalorder %s3230_s24, %s4281_s18 }
 0xb72   : > { %p3232_p4 = scmp.ne.s32.totalorder %s3230_s24, %s3231_s21  ;;  %p3237_p8 = scmp.lt.s32.totalorder %s3235_s26, %s3231_s21 }
 0xb74   : > { %p3233_p5 = pnand %p3232_p4, %p3478_p3  ;;  %p3238_p10 = por %p3237_p8, %p3236_p7 }
 0xb76   : > { %p3234_p6 = pneg %p3233_p5 }
 0xb78   : > { %p3239_p11 = pnand %p3238_p10, %p3234_p6 }
 0xb7a   : > { %3242 = shalt.err (!%p3239_p11)
}
 0xb7b   : > { %s3328_s1 = smov 128   ;;  %s4283_s22 = smov 8  }
 0xb7c   : > { %2978 = dma.vmem_to_hbm [thread:$0]  (%p3478_p3), %s2679_s30, 256, %s2681_s5, %s2666_s4, %s3328_s1, %s3328_s1, %s4283_s22  }
 0xb7d PF: > { %s4284_s2 = sld [smem:[#allocation13_spill]] }
 0xb7e   : > { %s4285_s27 = sld [smem:[#allocation6_spill]] }
 0xb83   : > { %p2984_p12 = scmp.ge.s32.totalorder %s4284_s2, 2 }
 0xb84   : > { %s2695_s23 = sand.u32 1, %s4285_s27  }
 0xb85   : > { %p2981_p13 = pnand %p2984_p12, %p3488_p9  ;;  %s2696_s3 = scalar_lea.sflag [#allocation4], %s2695_s23 }
 0xb87   : > { %p2982_p0 = pneg %p2981_p13 }
 0xb89   : > { %3276 = dma.done.wait (%p2982_p0), %s2696_s3, 256  }
 0xb8a   : > { %3278 = vsyncadd (%p2982_p0), %s2696_s3, 4294967040  ;;  %s32_s23 = sadd.s32 1, %s4284_s2   ;;  %s4287_s0 = sld [smem:[#allocation7_spill]] }
 0xb8b   : > { %p29_p1 = scmp.ge.s32.totalorder %s32_s23, 6   ;;  %s4288_s30 = sld [smem:[#allocation8_spill]] }
 0xb8c   : > { %s4289_s20 = sld [smem:[#allocation18_spill]] }
 0xb8d   : > { %s4290_s21 = sld [smem:[#allocation11_spill]]  ;;  %31 = sbr.rel (!%p29_p1) target bundleno = 16 (0x10), region = 179 }
 0xb8e   : > { %s4291_s1 = sld [smem:[#allocation12_spill]] }
 0xb8f   : > { %s4292_s22 = sld [smem:[#allocation14_spill]] }
 0xb90   : > { %s4293_s2 = sld [smem:[#allocation16_spill]] }
 0xb92   :  { %2702 = vsyncpa [#allocation4], 1 }
 0xb93   :  { %2704 = vsyncpa [#allocation4 + $0x1], 1 }

</bundles_post_ra>
